<compile_context>
chip_gen: v6e
topology: v6e:2x2x1
jax: 0.10.0
libtpu: 0.0.40
codegen_flags: <defaults>
</compile_context>

<pallas_src>
import functools

import jax
import jax.numpy as jnp
from jax import lax
from jax.experimental import pallas as pl
from jax.experimental.pallas import tpu as pltpu

EDGE_DIM = 2
INPUT_DIM = 1
HIDDEN_DIM = 1
LATENT_DIM = 1
HIDDEN_DIM2 = 2
NUM_CONV = 4
NUM_DEC_LAYERS = 5
BN_EPS = 1e-5

# Packing of all scalar-sized parameters into one SMEM f32 vector.
IDX_EW1_0 = 0    # edge-nn Linear(2,1) weight for edge_attr[:,0]
IDX_EW1_1 = 1    # edge-nn Linear(2,1) weight for edge_attr[:,1]
IDX_EB1 = 2      # edge-nn Linear(2,1) bias
IDX_EW2 = 3      # edge-nn Linear(1,1) weight
IDX_EB2 = 4      # edge-nn Linear(1,1) bias
IDX_ROOT = 5     # 4 NNConv root weights (1x1)
IDX_CBIAS = 9    # 4 NNConv biases
IDX_GAMMA = 13   # 4 BatchNorm gammas
IDX_BETA = 17    # 4 BatchNorm betas
IDX_MUW = 21
IDX_MUB = 22
IDX_LVW = 23
IDX_LVB = 24
IDX_DECW = 25    # 5 decoder layers x 4 weights (row-major [in, out])
IDX_DECB = 45    # 5 decoder layers x 2 biases
N_SCALARS = 56


def _gvae_kernel(scalars_ref, src_ref, dst_ref, ea_ref, x_ref, eps_ref,
                 out_ref, at_ref, z_ref, *, num_nodes, num_edges, block_e,
                 num_blocks):
    p = pl.program_id(0)   # 0: accumulate adjacency + conv chain; 1: decode edges
    i = pl.program_id(1)   # edge block

    @pl.when(jnp.logical_and(p == 0, i == 0))
    def _init():
        at_ref[...] = jnp.zeros_like(at_ref)

    # ------------------------- phase 0: accumulate A^T -----------------------
    @pl.when(p == 0)
    def _accumulate():
        # shared edge network on this block of edges (lane-dense [1, bE])
        ea = ea_ref[...]                                          # [2, bE]
        h1 = jnp.maximum(ea[0:1, :] * scalars_ref[IDX_EW1_0]
                         + ea[1:2, :] * scalars_ref[IDX_EW1_1]
                         + scalars_ref[IDX_EB1], 0.0)
        h = h1 * scalars_ref[IDX_EW2] + scalars_ref[IDX_EB2]      # [1, bE]

        # zero out contributions of padded edges (cheap, on the [1,bE] row)
        lane = lax.broadcasted_iota(jnp.int32, (1, block_e), 1)
        valid = (i * block_e + lane) < num_edges
        h = jnp.where(valid, h, 0.0)

        # one-hot masks built in-register with a single select each
        node_iota = lax.broadcasted_iota(jnp.int32, (num_nodes, block_e), 0)
        src_b = jnp.broadcast_to(src_ref[...], (num_nodes, block_e))
        dst_b = jnp.broadcast_to(dst_ref[...], (num_nodes, block_e))
        h_b = jnp.broadcast_to(h, (num_nodes, block_e))
        ms_h = jnp.where(node_iota == src_b, h_b, 0.0)            # [N, bE]
        md = jnp.where(node_iota == dst_b, 1.0, 0.0)              # [N, bE]

        # A^T[j, n] += sum_e h[e] * [src==j] * [dst==n] (contract edge/lane axis)
        at_ref[...] += lax.dot_general(
            ms_h, md, dimension_numbers=(((1,), (1,)), ((), ())),
            preferred_element_type=jnp.float32)

    # -------- end of phase 0: 4x(NNConv -> ReLU -> BN) + heads + reparam -----
    @pl.when(jnp.logical_and(p == 0, i == num_blocks - 1))
    def _finalize():
        x = x_ref[...]                                            # [1, N]
        at = at_ref[...]                                          # [N, N]
        inv_n = 1.0 / num_nodes
        for k in range(NUM_CONV):
            aggr = jnp.dot(x, at, preferred_element_type=jnp.float32)  # [1, N]
            out = jnp.maximum(aggr + x * scalars_ref[IDX_ROOT + k]
                              + scalars_ref[IDX_CBIAS + k], 0.0)
            # single-pass batch statistics: issue both reductions together
            s1 = jnp.sum(out, axis=1, keepdims=True)
            s2 = jnp.sum(out * out, axis=1, keepdims=True)
            mean = s1 * inv_n
            var = jnp.maximum(s2 * inv_n - mean * mean, 0.0)
            xhat = (out - mean) * lax.rsqrt(var + BN_EPS)
            x = scalars_ref[IDX_GAMMA + k] * xhat + scalars_ref[IDX_BETA + k]
        mu = x * scalars_ref[IDX_MUW] + scalars_ref[IDX_MUB]
        logvar = jnp.minimum(x * scalars_ref[IDX_LVW] + scalars_ref[IDX_LVB], 10.0)
        z_ref[...] = mu + eps_ref[...] * jnp.exp(0.5 * logvar)

    # ------------------------- phase 1: edge decoder --------------------------
    @pl.when(p == 1)
    def _decode():
        z = z_ref[...]                                            # [1, N]
        node_iota = lax.broadcasted_iota(jnp.int32, (num_nodes, block_e), 0)
        # two sequential [1,N]@[N,bE] gathers (keeps transient at one mask each)
        m_src = jnp.where(
            node_iota == jnp.broadcast_to(src_ref[...], (num_nodes, block_e)),
            1.0, 0.0)
        r0 = jnp.dot(z, m_src, preferred_element_type=jnp.float32)     # z[src]
        m_dst = jnp.where(
            node_iota == jnp.broadcast_to(dst_ref[...], (num_nodes, block_e)),
            1.0, 0.0)
        r1 = jnp.dot(z, m_dst, preferred_element_type=jnp.float32)     # z[dst]

        # 5 x Linear(2,2) decoder as VPU FMAs on lane-dense rows
        for l in range(NUM_DEC_LAYERS):
            wb = IDX_DECW + 4 * l
            bb = IDX_DECB + 2 * l
            n0 = (r0 * scalars_ref[wb + 0] + r1 * scalars_ref[wb + 2]
                  + scalars_ref[bb + 0])
            n1 = (r0 * scalars_ref[wb + 1] + r1 * scalars_ref[wb + 3]
                  + scalars_ref[bb + 1])
            if l < NUM_DEC_LAYERS - 1:
                n0 = jnp.maximum(n0, 0.0)
                n1 = jnp.maximum(n1, 0.0)
            r0, r1 = n0, n1

        out_ref[...] = jnp.concatenate([r0, r1], axis=0)          # [2, bE]


def _round_up(x, m):
    return (x + m - 1) // m * m


def _choose_block_e(num_edges, num_nodes, requested):
    """Pick a lane-dense edge block that fits the v7x VMEM budget."""
    be = min(requested, _round_up(max(num_edges, 1), 128))
    # Transient budget: keep N x N accumulator + two f32 [N, block_e] mask
    # temporaries comfortably under the v7x 32 MiB scoped / 64 MiB physical VMEM.
    budget = 24 * 1024 * 1024
    acc_bytes = 4 * num_nodes * num_nodes
    avail = max(budget - acc_bytes, 8 * max(num_nodes, 8) * 128)
    cap = avail // (8 * max(num_nodes, 8))
    cap = max(128, (cap // 128) * 128)
    return max(128, min(be, cap))


def gvae_forward(scalars, x, edge_index, edge_attr, eps, *, block_e=1024):
    """x: [N,1] f32; edge_index: [2,E] i32; edge_attr: [E,2] f32; eps: [N,1] f32.
    Returns decoded edge features [E, 2] (matches GVAE.forward)."""
    num_nodes = x.shape[0]
    num_edges = edge_index.shape[1]
    if num_edges == 0:   # degenerate graph: nothing to decode
        return jnp.zeros((0, EDGE_DIM), jnp.float32)

    block_e = _choose_block_e(num_edges, num_nodes, block_e)
    e_pad = _round_up(num_edges, block_e)
    num_blocks = e_pad // block_e

    # Lane-dense (edges on lanes) padded index / edge-attr rows.
    src = jnp.zeros((1, e_pad), jnp.int32).at[0, :num_edges].set(edge_index[0])
    dst = jnp.zeros((1, e_pad), jnp.int32).at[0, :num_edges].set(edge_index[1])
    ea_t = jnp.zeros((EDGE_DIM, e_pad), jnp.float32).at[:, :num_edges].set(edge_attr.T)
    x_row = x.reshape(1, num_nodes).astype(jnp.float32)
    eps_row = eps.reshape(1, num_nodes).astype(jnp.float32)

    smem_spec = pl.BlockSpec(memory_space=pltpu.MemorySpace.SMEM)
    node_row_spec = pl.BlockSpec((1, num_nodes), lambda p, i: (0, 0))
    edge_idx_spec = pl.BlockSpec((1, block_e), lambda p, i: (0, i))
    edge_attr_spec = pl.BlockSpec((EDGE_DIM, block_e), lambda p, i: (0, i))
    # Output block stays pinned at block 0 during phase 0 (no writebacks of an
    # unwritten buffer); sweeps the edge blocks during phase 1.
    out_spec = pl.BlockSpec((EDGE_DIM, block_e), lambda p, i: (0, i * p))

    # Explicit VMEM budget: accumulator + z + mask transients + double-buffered tiles.
    n_pad = _round_up(num_nodes, 128)
    vmem_est = (4 * num_nodes * num_nodes            # A^T accumulator
                + 4 * n_pad                          # z scratch
                + 8 * num_nodes * block_e            # two [N, block_e] f32 masks
                + 2 * (8 * block_e + 8 * block_e     # src/dst tiles (dbl-buffered)
                       + 8 * block_e + 8 * block_e)  # edge_attr + out tiles
                + 8 * n_pad)                         # x / eps rows
    vmem_limit = int(min(max(2 * vmem_est, 32 << 20), 56 << 20))

    out_t = pl.pallas_call(
        functools.partial(_gvae_kernel, num_nodes=num_nodes, num_edges=num_edges,
                          block_e=block_e, num_blocks=num_blocks),
        grid=(2, num_blocks),
        in_specs=[smem_spec, edge_idx_spec, edge_idx_spec, edge_attr_spec,
                  node_row_spec, node_row_spec],
        out_specs=out_spec,
        out_shape=jax.ShapeDtypeStruct((EDGE_DIM, e_pad), jnp.float32),
        scratch_shapes=[pltpu.VMEM((num_nodes, num_nodes), jnp.float32),
                        pltpu.VMEM((1, num_nodes), jnp.float32)],
        compiler_params=pltpu.CompilerParams(
            dimension_semantics=("arbitrary", "arbitrary"),
            vmem_limit_bytes=vmem_limit),
    )(scalars, src, dst, ea_t, x_row, eps_row)

    return out_t[:, :num_edges].T


def gvae_reference(scalars, x, edge_index, edge_attr, eps, dec_w, dec_b):
    """Plain-JAX reference with the module's exact semantics (two-pass BN var)."""
    num_nodes = x.shape[0]
    src, dst = edge_index[0], edge_index[1]
    h1 = jnp.maximum(edge_attr[:, 0:1] * scalars[IDX_EW1_0]
                     + edge_attr[:, 1:2] * scalars[IDX_EW1_1]
                     + scalars[IDX_EB1], 0.0)
    h = h1 * scalars[IDX_EW2] + scalars[IDX_EB2]                       # [E, 1]
    xx = x
    for k in range(NUM_CONV):
        msg = xx[src] * h
        aggr = jnp.zeros((num_nodes, 1), jnp.float32).at[dst].add(msg)
        out = jnp.maximum(aggr + xx * scalars[IDX_ROOT + k]
                          + scalars[IDX_CBIAS + k], 0.0)
        mean = out.mean(axis=0, keepdims=True)
        var = ((out - mean) ** 2).mean(axis=0, keepdims=True)
        xx = (scalars[IDX_GAMMA + k] * (out - mean) / jnp.sqrt(var + BN_EPS)
              + scalars[IDX_BETA + k])
    mu = xx * scalars[IDX_MUW] + scalars[IDX_MUB]
    logvar = jnp.minimum(xx * scalars[IDX_LVW] + scalars[IDX_LVB], 10.0)
    z = mu + eps * jnp.exp(0.5 * logvar)
    hdec = jnp.concatenate([z[src], z[dst]], axis=1)
    for l in range(NUM_DEC_LAYERS):
        hdec = hdec @ dec_w[l] + dec_b[l]
        if l < NUM_DEC_LAYERS - 1:
            hdec = jnp.maximum(hdec, 0.0)
    return hdec


if __name__ == "__main__":
    num_nodes, num_edges = 16, 37
    key = jax.random.PRNGKey(0)
    k_x, k_ei, k_ea, k_eps, k_sc, k_dw, k_db = jax.random.split(key, 7)

    # Graph inputs (torch_geometric style): x [N,1], edge_index [2,E], edge_attr [E,2]
    x = jax.random.normal(k_x, (num_nodes, INPUT_DIM), dtype=jnp.float32)
    edge_index = jax.random.randint(k_ei, (2, num_edges), 0, num_nodes,
                                    dtype=jnp.int32)
    edge_attr = jax.random.normal(k_ea, (num_edges, EDGE_DIM), dtype=jnp.float32)
    # Reparameterization noise (torch.randn_like equivalent), sampled once.
    eps = jax.random.normal(k_eps, (num_nodes, LATENT_DIM), dtype=jnp.float32)

    # Deterministic parameter init (shapes from GVAE.__init__; BN gamma=1, beta=0).
    rnd = 0.5 * jax.random.normal(k_sc, (N_SCALARS,), dtype=jnp.float32)
    dec_w = 0.5 * jax.random.normal(k_dw, (NUM_DEC_LAYERS, HIDDEN_DIM2, HIDDEN_DIM2),
                                    dtype=jnp.float32)
    dec_b = 0.1 * jax.random.normal(k_db, (NUM_DEC_LAYERS, HIDDEN_DIM2),
                                    dtype=jnp.float32)

    scalars = jnp.zeros((N_SCALARS,), jnp.float32)
    scalars = scalars.at[IDX_EW1_0:IDX_EB2 + 1].set(rnd[IDX_EW1_0:IDX_EB2 + 1])
    scalars = scalars.at[IDX_ROOT:IDX_ROOT + NUM_CONV].set(rnd[IDX_ROOT:IDX_ROOT + NUM_CONV])
    scalars = scalars.at[IDX_CBIAS:IDX_CBIAS + NUM_CONV].set(rnd[IDX_CBIAS:IDX_CBIAS + NUM_CONV])
    scalars = scalars.at[IDX_GAMMA:IDX_GAMMA + NUM_CONV].set(1.0)
    scalars = scalars.at[IDX_BETA:IDX_BETA + NUM_CONV].set(0.0)
    scalars = scalars.at[IDX_MUW:IDX_LVB + 1].set(rnd[IDX_MUW:IDX_LVB + 1])
    scalars = scalars.at[IDX_DECW:IDX_DECW + 4 * NUM_DEC_LAYERS].set(dec_w.reshape(-1))
    scalars = scalars.at[IDX_DECB:IDX_DECB + 2 * NUM_DEC_LAYERS].set(dec_b.reshape(-1))

    out = gvae_forward(scalars, x, edge_index, edge_attr, eps)
    out = jax.block_until_ready(out)

    ref = gvae_reference(scalars, x, edge_index, edge_attr, eps, dec_w, dec_b)
    max_err = float(jnp.max(jnp.abs(out - ref)))
    assert out.shape == (num_edges, EDGE_DIM), out.shape
    assert max_err < 1e-3, f"mismatch vs reference: {max_err}"

    print("KERNEL_OK")
</pallas_src>

<mosaic_0001>
module attributes {stable_mosaic.version = 11 : i64} {
  func.func @_gvae_kernel(%arg0: i32, %arg1: i32, %arg2: memref<56xf32, #tpu.memory_space<smem>>, %arg3: memref<1x128xi32, #tpu.memory_space<vmem>>, %arg4: memref<1x128xi32, #tpu.memory_space<vmem>>, %arg5: memref<2x128xf32, #tpu.memory_space<vmem>>, %arg6: memref<1x16xf32, #tpu.memory_space<vmem>>, %arg7: memref<1x16xf32, #tpu.memory_space<vmem>>, %arg8: memref<2x128xf32, #tpu.memory_space<vmem>>, %arg9: memref<16x16xf32, #tpu.memory_space<vmem>>, %arg10: memref<1x16xf32, #tpu.memory_space<vmem>>) attributes {dimension_semantics = [#tpu.dimension_semantics<arbitrary>, #tpu.dimension_semantics<arbitrary>], iteration_bounds = array<i64: 2, 1>, scalar_prefetch = 0 : i64, scratch_operands = 2 : i64, tpu.core_type = #tpu.core_type<tc>, window_params = [{transform_indices = @transform_0, window_bounds = array<i64: 56>}, {transform_indices = @transform_1, window_bounds = array<i64: 1, 128>}, {transform_indices = @transform_2, window_bounds = array<i64: 1, 128>}, {transform_indices = @transform_3, window_bounds = array<i64: 2, 128>}, {pipeline_mode = #tpu.pipeline_mode<synchronous>, transform_indices = @transform_4, window_bounds = array<i64: 1, 16>}, {pipeline_mode = #tpu.pipeline_mode<synchronous>, transform_indices = @transform_5, window_bounds = array<i64: 1, 16>}, {transform_indices = @transform_6, window_bounds = array<i64: 2, 128>}]} {
    %c0_i32 = arith.constant 0 : i32
    %0 = arith.cmpi eq, %arg0, %c0_i32 : i32
    %c0_i32_0 = arith.constant 0 : i32
    %1 = arith.cmpi eq, %arg1, %c0_i32_0 : i32
    %2 = arith.andi %0, %1 : i1
    %3 = arith.extui %2 : i1 to i32
    %c0_i32_1 = arith.constant 0 : i32
    %4 = arith.cmpi ne, %3, %c0_i32_1 : i32
    scf.if %4 {
      %cst = arith.constant 0.000000e+00 : f32
      %16 = vector.broadcast %cst : f32 to vector<16x16xf32>
      %c0 = arith.constant 0 : index
      %c0_8 = arith.constant 0 : index
      %17 = vector.load %arg9[%c0, %c0_8] : memref<16x16xf32, #tpu.memory_space<vmem>>, vector<16x16xf32>
      tpu.vector_store %arg9[%c0, %c0_8], %16 {strides = array<i32>} : memref<16x16xf32, #tpu.memory_space<vmem>>, vector<16x16xf32>,
    } else {
    }
    %c0_i32_2 = arith.constant 0 : i32
    %5 = arith.cmpi eq, %arg0, %c0_i32_2 : i32
    %6 = arith.extui %5 : i1 to i32
    %c0_i32_3 = arith.constant 0 : i32
    %7 = arith.cmpi ne, %6, %c0_i32_3 : i32
    scf.if %7 {
      %c0 = arith.constant 0 : index
      %c0_8 = arith.constant 0 : index
      %16 = vector.load %arg5[%c0, %c0_8] : memref<2x128xf32, #tpu.memory_space<vmem>>, vector<2x128xf32>
      %17 = vector.extract_strided_slice %16 {offsets = [0, 0], sizes = [1, 128], strides = [1, 1]} : vector<2x128xf32> to vector<1x128xf32>
      %c0_9 = arith.constant 0 : index
      %18 = memref.load %arg2[%c0_9] : memref<56xf32, #tpu.memory_space<smem>>
      %19 = vector.broadcast %18 : f32 to vector<1x128xf32>
      %20 = arith.mulf %17, %19 : vector<1x128xf32>
      %21 = vector.extract_strided_slice %16 {offsets = [1, 0], sizes = [1, 128], strides = [1, 1]} : vector<2x128xf32> to vector<1x128xf32>
      %c1 = arith.constant 1 : index
      %22 = memref.load %arg2[%c1] : memref<56xf32, #tpu.memory_space<smem>>
      %23 = vector.broadcast %22 : f32 to vector<1x128xf32>
      %24 = arith.mulf %21, %23 : vector<1x128xf32>
      %25 = arith.addf %20, %24 : vector<1x128xf32>
      %c2 = arith.constant 2 : index
      %26 = memref.load %arg2[%c2] : memref<56xf32, #tpu.memory_space<smem>>
      %27 = vector.broadcast %26 : f32 to vector<1x128xf32>
      %28 = arith.addf %25, %27 : vector<1x128xf32>
      %cst = arith.constant 0.000000e+00 : f32
      %29 = vector.broadcast %cst : f32 to vector<1x128xf32>
      %30 = arith.maximumf %28, %29 : vector<1x128xf32>
      %c3 = arith.constant 3 : index
      %31 = memref.load %arg2[%c3] : memref<56xf32, #tpu.memory_space<smem>>
      %32 = vector.broadcast %31 : f32 to vector<1x128xf32>
      %33 = arith.mulf %30, %32 : vector<1x128xf32>
      %c4 = arith.constant 4 : index
      %34 = memref.load %arg2[%c4] : memref<56xf32, #tpu.memory_space<smem>>
      %35 = vector.broadcast %34 : f32 to vector<1x128xf32>
      %36 = arith.addf %33, %35 : vector<1x128xf32>
      %37 = tpu.iota {dimensions = array<i32: 1>} : vector<1x128xi32>
      %c128_i32 = arith.constant 128 : i32
      %38 = arith.muli %arg1, %c128_i32 : i32
      %39 = vector.broadcast %38 : i32 to vector<1x128xi32>
      %40 = arith.addi %39, %37 : vector<1x128xi32>
      %c37_i32 = arith.constant 37 : i32
      %41 = vector.broadcast %c37_i32 : i32 to vector<1x128xi32>
      %42 = arith.cmpi slt, %40, %41 : vector<1x128xi32>
      %cst_10 = arith.constant 0.000000e+00 : f32
      %43 = vector.broadcast %cst_10 : f32 to vector<1x128xf32>
      %44 = arith.select %42, %36, %43 : vector<1x128xi1>, vector<1x128xf32>
      %45 = tpu.iota {dimensions = array<i32: 0>} : vector<16x128xi32>
      %c0_11 = arith.constant 0 : index
      %c0_12 = arith.constant 0 : index
      %46 = vector.load %arg3[%c0_11, %c0_12] : memref<1x128xi32, #tpu.memory_space<vmem>>, vector<1x128xi32>
      %47 = vector.shape_cast %46 : vector<1x128xi32> to vector<1x128xi32>
      %48 = vector.broadcast %47 : vector<1x128xi32> to vector<16x128xi32>
      %c0_13 = arith.constant 0 : index
      %c0_14 = arith.constant 0 : index
      %49 = vector.load %arg4[%c0_13, %c0_14] : memref<1x128xi32, #tpu.memory_space<vmem>>, vector<1x128xi32>
      %50 = vector.shape_cast %49 : vector<1x128xi32> to vector<1x128xi32>
      %51 = vector.broadcast %50 : vector<1x128xi32> to vector<16x128xi32>
      %52 = vector.shape_cast %44 : vector<1x128xf32> to vector<1x128xf32>
      %53 = vector.broadcast %52 : vector<1x128xf32> to vector<16x128xf32>
      %54 = arith.cmpi eq, %45, %48 : vector<16x128xi32>
      %cst_15 = arith.constant 0.000000e+00 : f32
      %55 = vector.broadcast %cst_15 : f32 to vector<16x128xf32>
      %56 = arith.select %54, %53, %55 : vector<16x128xi1>, vector<16x128xf32>
      %57 = arith.cmpi eq, %45, %51 : vector<16x128xi32>
      %cst_16 = arith.constant 1.000000e+00 : f32
      %cst_17 = arith.constant 0.000000e+00 : f32
      %58 = vector.broadcast %cst_16 : f32 to vector<16x128xf32>
      %59 = vector.broadcast %cst_17 : f32 to vector<16x128xf32>
      %60 = arith.select %57, %58, %59 : vector<16x128xi1>, vector<16x128xf32>
      %c0_18 = arith.constant 0 : index
      %c0_19 = arith.constant 0 : index
      %61 = vector.load %arg9[%c0_18, %c0_19] : memref<16x16xf32, #tpu.memory_space<vmem>>, vector<16x16xf32>
      %cst_20 = arith.constant dense<0.000000e+00> : vector<16x16xf32>
      %62 = tpu.matmul %56, %60, %cst_20 {dimension_numbers = #tpu.dot_dimension_numbers<[1], [1], [0], [0], [0, 0, 1, 0], [], []>} : vector<16x128xf32>, vector<16x128xf32>, vector<16x16xf32> -> vector<16x16xf32>
      %63 = arith.addf %61, %62 : vector<16x16xf32>
      %c0_21 = arith.constant 0 : index
      %c0_22 = arith.constant 0 : index
      %64 = vector.load %arg9[%c0_21, %c0_22] : memref<16x16xf32, #tpu.memory_space<vmem>>, vector<16x16xf32>
      tpu.vector_store %arg9[%c0_21, %c0_22], %63 {strides = array<i32>} : memref<16x16xf32, #tpu.memory_space<vmem>>, vector<16x16xf32>,
    } else {
    }
    %c0_i32_4 = arith.constant 0 : i32
    %8 = arith.cmpi eq, %arg0, %c0_i32_4 : i32
    %c0_i32_5 = arith.constant 0 : i32
    %9 = arith.cmpi eq, %arg1, %c0_i32_5 : i32
    %10 = arith.andi %8, %9 : i1
    %11 = arith.extui %10 : i1 to i32
    %c0_i32_6 = arith.constant 0 : i32
    %12 = arith.cmpi ne, %11, %c0_i32_6 : i32
    scf.if %12 {
      %c0 = arith.constant 0 : index
      %c0_8 = arith.constant 0 : index
      %16 = vector.load %arg6[%c0, %c0_8] : memref<1x16xf32, #tpu.memory_space<vmem>>, vector<1x16xf32>
      %c0_9 = arith.constant 0 : index
      %c0_10 = arith.constant 0 : index
      %17 = vector.load %arg9[%c0_9, %c0_10] : memref<16x16xf32, #tpu.memory_space<vmem>>, vector<16x16xf32>
      %cst = arith.constant dense<0.000000e+00> : vector<1x16xf32>
      %18 = tpu.matmul %16, %17, %cst {dimension_numbers = #tpu.dot_dimension_numbers<[1], [0], [0], [1], [0, 0, 1, 1], [], []>} : vector<1x16xf32>, vector<16x16xf32>, vector<1x16xf32> -> vector<1x16xf32>
      %c5 = arith.constant 5 : index
      %19 = memref.load %arg2[%c5] : memref<56xf32, #tpu.memory_space<smem>>
      %20 = vector.broadcast %19 : f32 to vector<1x16xf32>
      %21 = arith.mulf %16, %20 : vector<1x16xf32>
      %22 = arith.addf %18, %21 : vector<1x16xf32>
      %c9 = arith.constant 9 : index
      %23 = memref.load %arg2[%c9] : memref<56xf32, #tpu.memory_space<smem>>
      %24 = vector.broadcast %23 : f32 to vector<1x16xf32>
      %25 = arith.addf %22, %24 : vector<1x16xf32>
      %cst_11 = arith.constant 0.000000e+00 : f32
      %26 = vector.broadcast %cst_11 : f32 to vector<1x16xf32>
      %27 = arith.maximumf %25, %26 : vector<1x16xf32>
      %cst_12 = arith.constant dense<0.000000e+00> : vector<1xf32>
      %28 = vector.multi_reduction <add>, %27, %cst_12 [1] : vector<1x16xf32> to vector<1xf32>
      %29 = vector.shape_cast %28 : vector<1xf32> to vector<1x1xf32>
      %30 = arith.mulf %27, %27 : vector<1x16xf32>
      %cst_13 = arith.constant dense<0.000000e+00> : vector<1xf32>
      %31 = vector.multi_reduction <add>, %30, %cst_13 [1] : vector<1x16xf32> to vector<1xf32>
      %32 = vector.shape_cast %31 : vector<1xf32> to vector<1x1xf32>
      %cst_14 = arith.constant 6.250000e-02 : f32
      %33 = vector.broadcast %cst_14 : f32 to vector<1x1xf32>
      %34 = arith.mulf %29, %33 : vector<1x1xf32>
      %cst_15 = arith.constant 6.250000e-02 : f32
      %35 = vector.broadcast %cst_15 : f32 to vector<1x1xf32>
      %36 = arith.mulf %32, %35 : vector<1x1xf32>
      %37 = arith.mulf %34, %34 : vector<1x1xf32>
      %38 = arith.subf %36, %37 : vector<1x1xf32>
      %cst_16 = arith.constant 0.000000e+00 : f32
      %39 = vector.broadcast %cst_16 : f32 to vector<1x1xf32>
      %40 = arith.maximumf %38, %39 : vector<1x1xf32>
      %41 = vector.broadcast %34 : vector<1x1xf32> to vector<1x16xf32>
      %42 = arith.subf %27, %41 : vector<1x16xf32>
      %cst_17 = arith.constant 9.99999974E-6 : f32
      %43 = vector.broadcast %cst_17 : f32 to vector<1x1xf32>
      %44 = arith.addf %40, %43 : vector<1x1xf32>
      %45 = math.rsqrt %44 : vector<1x1xf32>
      %46 = vector.broadcast %45 : vector<1x1xf32> to vector<1x16xf32>
      %47 = arith.mulf %42, %46 : vector<1x16xf32>
      %c13 = arith.constant 13 : index
      %48 = memref.load %arg2[%c13] : memref<56xf32, #tpu.memory_space<smem>>
      %49 = vector.broadcast %48 : f32 to vector<1x16xf32>
      %50 = arith.mulf %49, %47 : vector<1x16xf32>
      %c17 = arith.constant 17 : index
      %51 = memref.load %arg2[%c17] : memref<56xf32, #tpu.memory_space<smem>>
      %52 = vector.broadcast %51 : f32 to vector<1x16xf32>
      %53 = arith.addf %50, %52 : vector<1x16xf32>
      %cst_18 = arith.constant dense<0.000000e+00> : vector<1x16xf32>
      %54 = tpu.matmul %53, %17, %cst_18 {dimension_numbers = #tpu.dot_dimension_numbers<[1], [0], [0], [1], [0, 0, 1, 1], [], []>} : vector<1x16xf32>, vector<16x16xf32>, vector<1x16xf32> -> vector<1x16xf32>
      %c6 = arith.constant 6 : index
      %55 = memref.load %arg2[%c6] : memref<56xf32, #tpu.memory_space<smem>>
      %56 = vector.broadcast %55 : f32 to vector<1x16xf32>
      %57 = arith.mulf %53, %56 : vector<1x16xf32>
      %58 = arith.addf %54, %57 : vector<1x16xf32>
      %c10 = arith.constant 10 : index
      %59 = memref.load %arg2[%c10] : memref<56xf32, #tpu.memory_space<smem>>
      %60 = vector.broadcast %59 : f32 to vector<1x16xf32>
      %61 = arith.addf %58, %60 : vector<1x16xf32>
      %cst_19 = arith.constant 0.000000e+00 : f32
      %62 = vector.broadcast %cst_19 : f32 to vector<1x16xf32>
      %63 = arith.maximumf %61, %62 : vector<1x16xf32>
      %cst_20 = arith.constant dense<0.000000e+00> : vector<1xf32>
      %64 = vector.multi_reduction <add>, %63, %cst_20 [1] : vector<1x16xf32> to vector<1xf32>
      %65 = vector.shape_cast %64 : vector<1xf32> to vector<1x1xf32>
      %66 = arith.mulf %63, %63 : vector<1x16xf32>
      %cst_21 = arith.constant dense<0.000000e+00> : vector<1xf32>
      %67 = vector.multi_reduction <add>, %66, %cst_21 [1] : vector<1x16xf32> to vector<1xf32>
      %68 = vector.shape_cast %67 : vector<1xf32> to vector<1x1xf32>
      %cst_22 = arith.constant 6.250000e-02 : f32
      %69 = vector.broadcast %cst_22 : f32 to vector<1x1xf32>
      %70 = arith.mulf %65, %69 : vector<1x1xf32>
      %cst_23 = arith.constant 6.250000e-02 : f32
      %71 = vector.broadcast %cst_23 : f32 to vector<1x1xf32>
      %72 = arith.mulf %68, %71 : vector<1x1xf32>
      %73 = arith.mulf %70, %70 : vector<1x1xf32>
      %74 = arith.subf %72, %73 : vector<1x1xf32>
      %cst_24 = arith.constant 0.000000e+00 : f32
      %75 = vector.broadcast %cst_24 : f32 to vector<1x1xf32>
      %76 = arith.maximumf %74, %75 : vector<1x1xf32>
      %77 = vector.broadcast %70 : vector<1x1xf32> to vector<1x16xf32>
      %78 = arith.subf %63, %77 : vector<1x16xf32>
      %cst_25 = arith.constant 9.99999974E-6 : f32
      %79 = vector.broadcast %cst_25 : f32 to vector<1x1xf32>
      %80 = arith.addf %76, %79 : vector<1x1xf32>
      %81 = math.rsqrt %80 : vector<1x1xf32>
      %82 = vector.broadcast %81 : vector<1x1xf32> to vector<1x16xf32>
      %83 = arith.mulf %78, %82 : vector<1x16xf32>
      %c14 = arith.constant 14 : index
      %84 = memref.load %arg2[%c14] : memref<56xf32, #tpu.memory_space<smem>>
      %85 = vector.broadcast %84 : f32 to vector<1x16xf32>
      %86 = arith.mulf %85, %83 : vector<1x16xf32>
      %c18 = arith.constant 18 : index
      %87 = memref.load %arg2[%c18] : memref<56xf32, #tpu.memory_space<smem>>
      %88 = vector.broadcast %87 : f32 to vector<1x16xf32>
      %89 = arith.addf %86, %88 : vector<1x16xf32>
      %cst_26 = arith.constant dense<0.000000e+00> : vector<1x16xf32>
      %90 = tpu.matmul %89, %17, %cst_26 {dimension_numbers = #tpu.dot_dimension_numbers<[1], [0], [0], [1], [0, 0, 1, 1], [], []>} : vector<1x16xf32>, vector<16x16xf32>, vector<1x16xf32> -> vector<1x16xf32>
      %c7 = arith.constant 7 : index
      %91 = memref.load %arg2[%c7] : memref<56xf32, #tpu.memory_space<smem>>
      %92 = vector.broadcast %91 : f32 to vector<1x16xf32>
      %93 = arith.mulf %89, %92 : vector<1x16xf32>
      %94 = arith.addf %90, %93 : vector<1x16xf32>
      %c11 = arith.constant 11 : index
      %95 = memref.load %arg2[%c11] : memref<56xf32, #tpu.memory_space<smem>>
      %96 = vector.broadcast %95 : f32 to vector<1x16xf32>
      %97 = arith.addf %94, %96 : vector<1x16xf32>
      %cst_27 = arith.constant 0.000000e+00 : f32
      %98 = vector.broadcast %cst_27 : f32 to vector<1x16xf32>
      %99 = arith.maximumf %97, %98 : vector<1x16xf32>
      %cst_28 = arith.constant dense<0.000000e+00> : vector<1xf32>
      %100 = vector.multi_reduction <add>, %99, %cst_28 [1] : vector<1x16xf32> to vector<1xf32>
      %101 = vector.shape_cast %100 : vector<1xf32> to vector<1x1xf32>
      %102 = arith.mulf %99, %99 : vector<1x16xf32>
      %cst_29 = arith.constant dense<0.000000e+00> : vector<1xf32>
      %103 = vector.multi_reduction <add>, %102, %cst_29 [1] : vector<1x16xf32> to vector<1xf32>
      %104 = vector.shape_cast %103 : vector<1xf32> to vector<1x1xf32>
      %cst_30 = arith.constant 6.250000e-02 : f32
      %105 = vector.broadcast %cst_30 : f32 to vector<1x1xf32>
      %106 = arith.mulf %101, %105 : vector<1x1xf32>
      %cst_31 = arith.constant 6.250000e-02 : f32
      %107 = vector.broadcast %cst_31 : f32 to vector<1x1xf32>
      %108 = arith.mulf %104, %107 : vector<1x1xf32>
      %109 = arith.mulf %106, %106 : vector<1x1xf32>
      %110 = arith.subf %108, %109 : vector<1x1xf32>
      %cst_32 = arith.constant 0.000000e+00 : f32
      %111 = vector.broadcast %cst_32 : f32 to vector<1x1xf32>
      %112 = arith.maximumf %110, %111 : vector<1x1xf32>
      %113 = vector.broadcast %106 : vector<1x1xf32> to vector<1x16xf32>
      %114 = arith.subf %99, %113 : vector<1x16xf32>
      %cst_33 = arith.constant 9.99999974E-6 : f32
      %115 = vector.broadcast %cst_33 : f32 to vector<1x1xf32>
      %116 = arith.addf %112, %115 : vector<1x1xf32>
      %117 = math.rsqrt %116 : vector<1x1xf32>
      %118 = vector.broadcast %117 : vector<1x1xf32> to vector<1x16xf32>
      %119 = arith.mulf %114, %118 : vector<1x16xf32>
      %c15 = arith.constant 15 : index
      %120 = memref.load %arg2[%c15] : memref<56xf32, #tpu.memory_space<smem>>
      %121 = vector.broadcast %120 : f32 to vector<1x16xf32>
      %122 = arith.mulf %121, %119 : vector<1x16xf32>
      %c19 = arith.constant 19 : index
      %123 = memref.load %arg2[%c19] : memref<56xf32, #tpu.memory_space<smem>>
      %124 = vector.broadcast %123 : f32 to vector<1x16xf32>
      %125 = arith.addf %122, %124 : vector<1x16xf32>
      %cst_34 = arith.constant dense<0.000000e+00> : vector<1x16xf32>
      %126 = tpu.matmul %125, %17, %cst_34 {dimension_numbers = #tpu.dot_dimension_numbers<[1], [0], [0], [1], [0, 0, 1, 1], [], []>} : vector<1x16xf32>, vector<16x16xf32>, vector<1x16xf32> -> vector<1x16xf32>
      %c8 = arith.constant 8 : index
      %127 = memref.load %arg2[%c8] : memref<56xf32, #tpu.memory_space<smem>>
      %128 = vector.broadcast %127 : f32 to vector<1x16xf32>
      %129 = arith.mulf %125, %128 : vector<1x16xf32>
      %130 = arith.addf %126, %129 : vector<1x16xf32>
      %c12 = arith.constant 12 : index
      %131 = memref.load %arg2[%c12] : memref<56xf32, #tpu.memory_space<smem>>
      %132 = vector.broadcast %131 : f32 to vector<1x16xf32>
      %133 = arith.addf %130, %132 : vector<1x16xf32>
      %cst_35 = arith.constant 0.000000e+00 : f32
      %134 = vector.broadcast %cst_35 : f32 to vector<1x16xf32>
      %135 = arith.maximumf %133, %134 : vector<1x16xf32>
      %cst_36 = arith.constant dense<0.000000e+00> : vector<1xf32>
      %136 = vector.multi_reduction <add>, %135, %cst_36 [1] : vector<1x16xf32> to vector<1xf32>
      %137 = vector.shape_cast %136 : vector<1xf32> to vector<1x1xf32>
      %138 = arith.mulf %135, %135 : vector<1x16xf32>
      %cst_37 = arith.constant dense<0.000000e+00> : vector<1xf32>
      %139 = vector.multi_reduction <add>, %138, %cst_37 [1] : vector<1x16xf32> to vector<1xf32>
      %140 = vector.shape_cast %139 : vector<1xf32> to vector<1x1xf32>
      %cst_38 = arith.constant 6.250000e-02 : f32
      %141 = vector.broadcast %cst_38 : f32 to vector<1x1xf32>
      %142 = arith.mulf %137, %141 : vector<1x1xf32>
      %cst_39 = arith.constant 6.250000e-02 : f32
      %143 = vector.broadcast %cst_39 : f32 to vector<1x1xf32>
      %144 = arith.mulf %140, %143 : vector<1x1xf32>
      %145 = arith.mulf %142, %142 : vector<1x1xf32>
      %146 = arith.subf %144, %145 : vector<1x1xf32>
      %cst_40 = arith.constant 0.000000e+00 : f32
      %147 = vector.broadcast %cst_40 : f32 to vector<1x1xf32>
      %148 = arith.maximumf %146, %147 : vector<1x1xf32>
      %149 = vector.broadcast %142 : vector<1x1xf32> to vector<1x16xf32>
      %150 = arith.subf %135, %149 : vector<1x16xf32>
      %cst_41 = arith.constant 9.99999974E-6 : f32
      %151 = vector.broadcast %cst_41 : f32 to vector<1x1xf32>
      %152 = arith.addf %148, %151 : vector<1x1xf32>
      %153 = math.rsqrt %152 : vector<1x1xf32>
      %154 = vector.broadcast %153 : vector<1x1xf32> to vector<1x16xf32>
      %155 = arith.mulf %150, %154 : vector<1x16xf32>
      %c16 = arith.constant 16 : index
      %156 = memref.load %arg2[%c16] : memref<56xf32, #tpu.memory_space<smem>>
      %157 = vector.broadcast %156 : f32 to vector<1x16xf32>
      %158 = arith.mulf %157, %155 : vector<1x16xf32>
      %c20 = arith.constant 20 : index
      %159 = memref.load %arg2[%c20] : memref<56xf32, #tpu.memory_space<smem>>
      %160 = vector.broadcast %159 : f32 to vector<1x16xf32>
      %161 = arith.addf %158, %160 : vector<1x16xf32>
      %c21 = arith.constant 21 : index
      %162 = memref.load %arg2[%c21] : memref<56xf32, #tpu.memory_space<smem>>
      %163 = vector.broadcast %162 : f32 to vector<1x16xf32>
      %164 = arith.mulf %161, %163 : vector<1x16xf32>
      %c22 = arith.constant 22 : index
      %165 = memref.load %arg2[%c22] : memref<56xf32, #tpu.memory_space<smem>>
      %166 = vector.broadcast %165 : f32 to vector<1x16xf32>
      %167 = arith.addf %164, %166 : vector<1x16xf32>
      %c23 = arith.constant 23 : index
      %168 = memref.load %arg2[%c23] : memref<56xf32, #tpu.memory_space<smem>>
      %169 = vector.broadcast %168 : f32 to vector<1x16xf32>
      %170 = arith.mulf %161, %169 : vector<1x16xf32>
      %c24 = arith.constant 24 : index
      %171 = memref.load %arg2[%c24] : memref<56xf32, #tpu.memory_space<smem>>
      %172 = vector.broadcast %171 : f32 to vector<1x16xf32>
      %173 = arith.addf %170, %172 : vector<1x16xf32>
      %cst_42 = arith.constant 1.000000e+01 : f32
      %174 = vector.broadcast %cst_42 : f32 to vector<1x16xf32>
      %175 = arith.minimumf %173, %174 : vector<1x16xf32>
      %c0_43 = arith.constant 0 : index
      %c0_44 = arith.constant 0 : index
      %176 = vector.load %arg7[%c0_43, %c0_44] : memref<1x16xf32, #tpu.memory_space<vmem>>, vector<1x16xf32>
      %cst_45 = arith.constant 5.000000e-01 : f32
      %177 = vector.broadcast %cst_45 : f32 to vector<1x16xf32>
      %178 = arith.mulf %177, %175 : vector<1x16xf32>
      %179 = math.exp %178 : vector<1x16xf32>
      %180 = arith.mulf %176, %179 : vector<1x16xf32>
      %181 = arith.addf %167, %180 : vector<1x16xf32>
      %c0_46 = arith.constant 0 : index
      %c0_47 = arith.constant 0 : index
      %182 = vector.load %arg10[%c0_46, %c0_47] : memref<1x16xf32, #tpu.memory_space<vmem>>, vector<1x16xf32>
      tpu.vector_store %arg10[%c0_46, %c0_47], %181 {strides = array<i32>} : memref<1x16xf32, #tpu.memory_space<vmem>>, vector<1x16xf32>,
    } else {
    }
    %c1_i32 = arith.constant 1 : i32
    %13 = arith.cmpi eq, %arg0, %c1_i32 : i32
    %14 = arith.extui %13 : i1 to i32
    %c0_i32_7 = arith.constant 0 : i32
    %15 = arith.cmpi ne, %14, %c0_i32_7 : i32
    scf.if %15 {
      %c0 = arith.constant 0 : index
      %c0_8 = arith.constant 0 : index
      %16 = vector.load %arg10[%c0, %c0_8] : memref<1x16xf32, #tpu.memory_space<vmem>>, vector<1x16xf32>
      %17 = tpu.iota {dimensions = array<i32: 0>} : vector<16x128xi32>
      %c0_9 = arith.constant 0 : index
      %c0_10 = arith.constant 0 : index
      %18 = vector.load %arg3[%c0_9, %c0_10] : memref<1x128xi32, #tpu.memory_space<vmem>>, vector<1x128xi32>
      %19 = vector.shape_cast %18 : vector<1x128xi32> to vector<1x128xi32>
      %20 = vector.broadcast %19 : vector<1x128xi32> to vector<16x128xi32>
      %21 = arith.cmpi eq, %17, %20 : vector<16x128xi32>
      %cst = arith.constant 1.000000e+00 : f32
      %cst_11 = arith.constant 0.000000e+00 : f32
      %22 = vector.broadcast %cst : f32 to vector<16x128xf32>
      %23 = vector.broadcast %cst_11 : f32 to vector<16x128xf32>
      %24 = arith.select %21, %22, %23 : vector<16x128xi1>, vector<16x128xf32>
      %cst_12 = arith.constant dense<0.000000e+00> : vector<1x128xf32>
      %25 = tpu.matmul %16, %24, %cst_12 {dimension_numbers = #tpu.dot_dimension_numbers<[1], [0], [0], [1], [0, 0, 1, 1], [], []>} : vector<1x16xf32>, vector<16x128xf32>, vector<1x128xf32> -> vector<1x128xf32>
      %c0_13 = arith.constant 0 : index
      %c0_14 = arith.constant 0 : index
      %26 = vector.load %arg4[%c0_13, %c0_14] : memref<1x128xi32, #tpu.memory_space<vmem>>, vector<1x128xi32>
      %27 = vector.shape_cast %26 : vector<1x128xi32> to vector<1x128xi32>
      %28 = vector.broadcast %27 : vector<1x128xi32> to vector<16x128xi32>
      %29 = arith.cmpi eq, %17, %28 : vector<16x128xi32>
      %cst_15 = arith.constant 1.000000e+00 : f32
      %cst_16 = arith.constant 0.000000e+00 : f32
      %30 = vector.broadcast %cst_15 : f32 to vector<16x128xf32>
      %31 = vector.broadcast %cst_16 : f32 to vector<16x128xf32>
      %32 = arith.select %29, %30, %31 : vector<16x128xi1>, vector<16x128xf32>
      %cst_17 = arith.constant dense<0.000000e+00> : vector<1x128xf32>
      %33 = tpu.matmul %16, %32, %cst_17 {dimension_numbers = #tpu.dot_dimension_numbers<[1], [0], [0], [1], [0, 0, 1, 1], [], []>} : vector<1x16xf32>, vector<16x128xf32>, vector<1x128xf32> -> vector<1x128xf32>
      %c25 = arith.constant 25 : index
      %34 = memref.load %arg2[%c25] : memref<56xf32, #tpu.memory_space<smem>>
      %35 = vector.broadcast %34 : f32 to vector<1x128xf32>
      %36 = arith.mulf %25, %35 : vector<1x128xf32>
      %c27 = arith.constant 27 : index
      %37 = memref.load %arg2[%c27] : memref<56xf32, #tpu.memory_space<smem>>
      %38 = vector.broadcast %37 : f32 to vector<1x128xf32>
      %39 = arith.mulf %33, %38 : vector<1x128xf32>
      %40 = arith.addf %36, %39 : vector<1x128xf32>
      %c45 = arith.constant 45 : index
      %41 = memref.load %arg2[%c45] : memref<56xf32, #tpu.memory_space<smem>>
      %42 = vector.broadcast %41 : f32 to vector<1x128xf32>
      %43 = arith.addf %40, %42 : vector<1x128xf32>
      %c26 = arith.constant 26 : index
      %44 = memref.load %arg2[%c26] : memref<56xf32, #tpu.memory_space<smem>>
      %45 = vector.broadcast %44 : f32 to vector<1x128xf32>
      %46 = arith.mulf %25, %45 : vector<1x128xf32>
      %c28 = arith.constant 28 : index
      %47 = memref.load %arg2[%c28] : memref<56xf32, #tpu.memory_space<smem>>
      %48 = vector.broadcast %47 : f32 to vector<1x128xf32>
      %49 = arith.mulf %33, %48 : vector<1x128xf32>
      %50 = arith.addf %46, %49 : vector<1x128xf32>
      %c46 = arith.constant 46 : index
      %51 = memref.load %arg2[%c46] : memref<56xf32, #tpu.memory_space<smem>>
      %52 = vector.broadcast %51 : f32 to vector<1x128xf32>
      %53 = arith.addf %50, %52 : vector<1x128xf32>
      %cst_18 = arith.constant 0.000000e+00 : f32
      %54 = vector.broadcast %cst_18 : f32 to vector<1x128xf32>
      %55 = arith.maximumf %43, %54 : vector<1x128xf32>
      %cst_19 = arith.constant 0.000000e+00 : f32
      %56 = vector.broadcast %cst_19 : f32 to vector<1x128xf32>
      %57 = arith.maximumf %53, %56 : vector<1x128xf32>
      %c29 = arith.constant 29 : index
      %58 = memref.load %arg2[%c29] : memref<56xf32, #tpu.memory_space<smem>>
      %59 = vector.broadcast %58 : f32 to vector<1x128xf32>
      %60 = arith.mulf %55, %59 : vector<1x128xf32>
      %c31 = arith.constant 31 : index
      %61 = memref.load %arg2[%c31] : memref<56xf32, #tpu.memory_space<smem>>
      %62 = vector.broadcast %61 : f32 to vector<1x128xf32>
      %63 = arith.mulf %57, %62 : vector<1x128xf32>
      %64 = arith.addf %60, %63 : vector<1x128xf32>
      %c47 = arith.constant 47 : index
      %65 = memref.load %arg2[%c47] : memref<56xf32, #tpu.memory_space<smem>>
      %66 = vector.broadcast %65 : f32 to vector<1x128xf32>
      %67 = arith.addf %64, %66 : vector<1x128xf32>
      %c30 = arith.constant 30 : index
      %68 = memref.load %arg2[%c30] : memref<56xf32, #tpu.memory_space<smem>>
      %69 = vector.broadcast %68 : f32 to vector<1x128xf32>
      %70 = arith.mulf %55, %69 : vector<1x128xf32>
      %c32 = arith.constant 32 : index
      %71 = memref.load %arg2[%c32] : memref<56xf32, #tpu.memory_space<smem>>
      %72 = vector.broadcast %71 : f32 to vector<1x128xf32>
      %73 = arith.mulf %57, %72 : vector<1x128xf32>
      %74 = arith.addf %70, %73 : vector<1x128xf32>
      %c48 = arith.constant 48 : index
      %75 = memref.load %arg2[%c48] : memref<56xf32, #tpu.memory_space<smem>>
      %76 = vector.broadcast %75 : f32 to vector<1x128xf32>
      %77 = arith.addf %74, %76 : vector<1x128xf32>
      %cst_20 = arith.constant 0.000000e+00 : f32
      %78 = vector.broadcast %cst_20 : f32 to vector<1x128xf32>
      %79 = arith.maximumf %67, %78 : vector<1x128xf32>
      %cst_21 = arith.constant 0.000000e+00 : f32
      %80 = vector.broadcast %cst_21 : f32 to vector<1x128xf32>
      %81 = arith.maximumf %77, %80 : vector<1x128xf32>
      %c33 = arith.constant 33 : index
      %82 = memref.load %arg2[%c33] : memref<56xf32, #tpu.memory_space<smem>>
      %83 = vector.broadcast %82 : f32 to vector<1x128xf32>
      %84 = arith.mulf %79, %83 : vector<1x128xf32>
      %c35 = arith.constant 35 : index
      %85 = memref.load %arg2[%c35] : memref<56xf32, #tpu.memory_space<smem>>
      %86 = vector.broadcast %85 : f32 to vector<1x128xf32>
      %87 = arith.mulf %81, %86 : vector<1x128xf32>
      %88 = arith.addf %84, %87 : vector<1x128xf32>
      %c49 = arith.constant 49 : index
      %89 = memref.load %arg2[%c49] : memref<56xf32, #tpu.memory_space<smem>>
      %90 = vector.broadcast %89 : f32 to vector<1x128xf32>
      %91 = arith.addf %88, %90 : vector<1x128xf32>
      %c34 = arith.constant 34 : index
      %92 = memref.load %arg2[%c34] : memref<56xf32, #tpu.memory_space<smem>>
      %93 = vector.broadcast %92 : f32 to vector<1x128xf32>
      %94 = arith.mulf %79, %93 : vector<1x128xf32>
      %c36 = arith.constant 36 : index
      %95 = memref.load %arg2[%c36] : memref<56xf32, #tpu.memory_space<smem>>
      %96 = vector.broadcast %95 : f32 to vector<1x128xf32>
      %97 = arith.mulf %81, %96 : vector<1x128xf32>
      %98 = arith.addf %94, %97 : vector<1x128xf32>
      %c50 = arith.constant 50 : index
      %99 = memref.load %arg2[%c50] : memref<56xf32, #tpu.memory_space<smem>>
      %100 = vector.broadcast %99 : f32 to vector<1x128xf32>
      %101 = arith.addf %98, %100 : vector<1x128xf32>
      %cst_22 = arith.constant 0.000000e+00 : f32
      %102 = vector.broadcast %cst_22 : f32 to vector<1x128xf32>
      %103 = arith.maximumf %91, %102 : vector<1x128xf32>
      %cst_23 = arith.constant 0.000000e+00 : f32
      %104 = vector.broadcast %cst_23 : f32 to vector<1x128xf32>
      %105 = arith.maximumf %101, %104 : vector<1x128xf32>
      %c37 = arith.constant 37 : index
      %106 = memref.load %arg2[%c37] : memref<56xf32, #tpu.memory_space<smem>>
      %107 = vector.broadcast %106 : f32 to vector<1x128xf32>
      %108 = arith.mulf %103, %107 : vector<1x128xf32>
      %c39 = arith.constant 39 : index
      %109 = memref.load %arg2[%c39] : memref<56xf32, #tpu.memory_space<smem>>
      %110 = vector.broadcast %109 : f32 to vector<1x128xf32>
      %111 = arith.mulf %105, %110 : vector<1x128xf32>
      %112 = arith.addf %108, %111 : vector<1x128xf32>
      %c51 = arith.constant 51 : index
      %113 = memref.load %arg2[%c51] : memref<56xf32, #tpu.memory_space<smem>>
      %114 = vector.broadcast %113 : f32 to vector<1x128xf32>
      %115 = arith.addf %112, %114 : vector<1x128xf32>
      %c38 = arith.constant 38 : index
      %116 = memref.load %arg2[%c38] : memref<56xf32, #tpu.memory_space<smem>>
      %117 = vector.broadcast %116 : f32 to vector<1x128xf32>
      %118 = arith.mulf %103, %117 : vector<1x128xf32>
      %c40 = arith.constant 40 : index
      %119 = memref.load %arg2[%c40] : memref<56xf32, #tpu.memory_space<smem>>
      %120 = vector.broadcast %119 : f32 to vector<1x128xf32>
      %121 = arith.mulf %105, %120 : vector<1x128xf32>
      %122 = arith.addf %118, %121 : vector<1x128xf32>
      %c52 = arith.constant 52 : index
      %123 = memref.load %arg2[%c52] : memref<56xf32, #tpu.memory_space<smem>>
      %124 = vector.broadcast %123 : f32 to vector<1x128xf32>
      %125 = arith.addf %122, %124 : vector<1x128xf32>
      %cst_24 = arith.constant 0.000000e+00 : f32
      %126 = vector.broadcast %cst_24 : f32 to vector<1x128xf32>
      %127 = arith.maximumf %115, %126 : vector<1x128xf32>
      %cst_25 = arith.constant 0.000000e+00 : f32
      %128 = vector.broadcast %cst_25 : f32 to vector<1x128xf32>
      %129 = arith.maximumf %125, %128 : vector<1x128xf32>
      %c41 = arith.constant 41 : index
      %130 = memref.load %arg2[%c41] : memref<56xf32, #tpu.memory_space<smem>>
      %131 = vector.broadcast %130 : f32 to vector<1x128xf32>
      %132 = arith.mulf %127, %131 : vector<1x128xf32>
      %c43 = arith.constant 43 : index
      %133 = memref.load %arg2[%c43] : memref<56xf32, #tpu.memory_space<smem>>
      %134 = vector.broadcast %133 : f32 to vector<1x128xf32>
      %135 = arith.mulf %129, %134 : vector<1x128xf32>
      %136 = arith.addf %132, %135 : vector<1x128xf32>
      %c53 = arith.constant 53 : index
      %137 = memref.load %arg2[%c53] : memref<56xf32, #tpu.memory_space<smem>>
      %138 = vector.broadcast %137 : f32 to vector<1x128xf32>
      %139 = arith.addf %136, %138 : vector<1x128xf32>
      %c42 = arith.constant 42 : index
      %140 = memref.load %arg2[%c42] : memref<56xf32, #tpu.memory_space<smem>>
      %141 = vector.broadcast %140 : f32 to vector<1x128xf32>
      %142 = arith.mulf %127, %141 : vector<1x128xf32>
      %c44 = arith.constant 44 : index
      %143 = memref.load %arg2[%c44] : memref<56xf32, #tpu.memory_space<smem>>
      %144 = vector.broadcast %143 : f32 to vector<1x128xf32>
      %145 = arith.mulf %129, %144 : vector<1x128xf32>
      %146 = arith.addf %142, %145 : vector<1x128xf32>
      %c54 = arith.constant 54 : index
      %147 = memref.load %arg2[%c54] : memref<56xf32, #tpu.memory_space<smem>>
      %148 = vector.broadcast %147 : f32 to vector<1x128xf32>
      %149 = arith.addf %146, %148 : vector<1x128xf32>
      %150 = tpu.concatenate %139, %149 in 0 : vector<1x128xf32>, vector<1x128xf32> -> vector<2x128xf32>
      %c0_26 = arith.constant 0 : index
      %c0_27 = arith.constant 0 : index
      %151 = vector.load %arg8[%c0_26, %c0_27] : memref<2x128xf32, #tpu.memory_space<vmem>>, vector<2x128xf32>
      tpu.vector_store %arg8[%c0_26, %c0_27], %150 {strides = array<i32>} : memref<2x128xf32, #tpu.memory_space<vmem>>, vector<2x128xf32>,
    } else {
    }
    return
  }
  func.func @transform_0(%arg0: i32, %arg1: i32) -> i32 {
    %c0_i32 = arith.constant 0 : i32
    %c0_i32_0 = arith.constant 0 : i32
    return %c0_i32 : i32
  }
  func.func @transform_1(%arg0: i32, %arg1: i32) -> (i32, i32) {
    %c0_i32 = arith.constant 0 : i32
    %c0_i32_0 = arith.constant 0 : i32
    return %c0_i32, %arg1 : i32, i32
  }
  func.func @transform_2(%arg0: i32, %arg1: i32) -> (i32, i32) {
    %c0_i32 = arith.constant 0 : i32
    %c0_i32_0 = arith.constant 0 : i32
    return %c0_i32, %arg1 : i32, i32
  }
  func.func @transform_3(%arg0: i32, %arg1: i32) -> (i32, i32) {
    %c0_i32 = arith.constant 0 : i32
    %c0_i32_0 = arith.constant 0 : i32
    return %c0_i32, %arg1 : i32, i32
  }
  func.func @transform_4(%arg0: i32, %arg1: i32) -> (i32, i32) {
    %c0_i32 = arith.constant 0 : i32
    %c0_i32_0 = arith.constant 0 : i32
    %c0_i32_1 = arith.constant 0 : i32
    return %c0_i32, %c0_i32_0 : i32, i32
  }
  func.func @transform_5(%arg0: i32, %arg1: i32) -> (i32, i32) {
    %c0_i32 = arith.constant 0 : i32
    %c0_i32_0 = arith.constant 0 : i32
    %c0_i32_1 = arith.constant 0 : i32
    return %c0_i32, %c0_i32_0 : i32, i32
  }
  func.func @transform_6(%arg0: i32, %arg1: i32) -> (i32, i32) {
    %0 = arith.muli %arg1, %arg0 : i32
    %c0_i32 = arith.constant 0 : i32
    %c0_i32_0 = arith.constant 0 : i32
    return %c0_i32, %0 : i32, i32
  }
}

</mosaic_0001>

<bundles_post_ra>
// kernel: tpu_custom_call.1
= control target key start
LH: loop header
LB: loop body
LE: loop exit
PB: predicated region body
PF: predicated region fallthrough
CT: control target
= control target key end

     0   :  { %11 = vsyncpa [#allocation7], 0  ;;  %s1830_s0 = inlined_call_operand.hbm [shape: f32[56], index: 0, kind: input, shape index: {}]   ;;  %s1831_s1 = inlined_call_operand.vmem [shape: s32[1,128], index: 1, kind: input, shape index: {}]   ;;  %s1832_s2 = inlined_call_operand.hbm [shape: s32[1,128], index: 2, kind: input, shape index: {}]   ;;  %s1833_s3 = inlined_call_operand.vmem [shape: f32[2,128], index: 3, kind: input, shape index: {}]   ;;  %s1834_s4 = inlined_call_operand.vmem [shape: f32[1,16], index: 4, kind: input, shape index: {}]   ;;  %s1835_s5 = inlined_call_operand.vmem [shape: f32[1,16], index: 5, kind: input, shape index: {}]   ;;  %s1836_s6 = inlined_call_operand.hbm [shape: f32[2,128], index: 6, kind: output, shape index: {}]  }
   0x1   :  { %12 = vsyncpa [#allocation5], 0 }
   0x2   :  { %13 = vsyncpa [#allocation6], 0 }
   0x3   :  { %15 = vsyncpa [#allocation6 + $0x1], 0  ;;  %s1674_s21 = smov 0   ;;  %s1676_s22 = smov 0  }
   0x4   :  { %s1678_s23 = smov 0  }
   0x5 LB: > { %s1297_s24 = sadd.s32 4294967295, %s1627_s23   ;;  %s1298_s25 = sadd.s32 4294967294, %s1627_s23   ;;  %s1627_s23 = sphi %s1678_s23, %s21_s23   ;;  %s1623_s22 = sphi %s1676_s22, %s1842_s22   ;;  %s1619_s21 = sphi %s1674_s21, %s1841_s21  }
   0x6   : > { %s33_s26 = sadd.s32 1, %s1623_s22  ;;  %p1299_p0 = scmp.ge.s32.totalorder %s1627_s23, 1 }
   0x7   : > { %p35_p1 = scmp.ge.s32.totalorder %s33_s26, 2  ;;  %p207_p2 = scmp.lt.s32.totalorder %s1627_s23, 3 }
   0x8   : > { %p1702_p4 = scmp.eq.s32.totalorder %s1297_s24, 0  ;;  %s1629_s29 = smov [#allocation8]  }
   0x9   : > { %s1844_s26 = smov (%p35_p1, %s33_s26), 0  ;;  %p1696_p3 = pnand %p1299_p0, %p207_p2 }
   0xa   : > { %s237_s30 = sshll.u32 %s1629_s29, 4  ;;  %s1630_s8 = smov [#allocation4]   ;;  %s238_s30 = int_to_ptr.vmem [resolvable:$true] %s237_s30 }
   0xb   : > { %p1470_p5 = pneg %p1696_p3  ;;  %s1554_s11 = scalar_lea.vmem %s238_s30, 16 }
   0xc   : > { %p1555_p8 = scmp.ne.s32.totalorder %s238_s30, %s1554_s11  ;;  %s1561_s12 = scalar_lea.vmem %s238_s30, 32 }
   0xd   : > { %p1710_p6 = pnand %p1702_p4, %p1470_p5  ;;  %p1562_p11 = scmp.lt.s32.totalorder %s238_s30, %s238_s30 }
   0xe   : > { %p1563_p12 = scmp.lt.s32.totalorder %s1561_s12, %s1554_s11 }
   0xf   : > { %1473 = dma.hbm_to_smem (!%p1710_p6), %s1830_s0, 16, %s1630_s8, [#allocation7]  }
  0x10   : > { %p1545_p7 = pneg %p1710_p6  ;;  %p1564_p13 = por %p1563_p12, %p1562_p11 }
  0x12   : > { %p1557_p9 = pnand %p1555_p8, %p1545_p7 }
  0x14   : > { %p1558_p10 = pneg %p1557_p9 }
  0x16   : > { %p1565_p0 = pnand %p1564_p13, %p1558_p10 }
  0x18   : > { %1568 = shalt.err (!%p1565_p0)
}
  0x19   : > { %1476 = dma.hbm_to_vmem [thread:$0]  (!%p1710_p6), %s1832_s2, 16, %s238_s30, [#allocation5]  }
  0x1a   : > { %263 = sbr.rel (%p1696_p3) target bundleno = 2046 (0x7fe), region = 44 }
  0x1f   : > { %1606 = dma.done.wait (%p1702_p4), [#allocation7], 16  }
  0x20   : > { %1608 = vsyncadd (%p1702_p4), [#allocation7], 4294967280 }
  0x21   : > { %1610 = dma.done.wait (%p1702_p4), [#allocation5], 16  }
  0x22   : > { %1612 = vsyncadd (%p1702_p4), [#allocation5], 4294967280 }
  0x23   : > { %273 = sfence }
  0x24   : > { %p308_p1 = scmp.eq.s32.totalorder %s1619_s21, 0 }
  0x25   : > { %vm314_vm0 = vcmask (%p308_p1), 130048   ;;  %v1631_v0 = vmov (%p308_p1), 0.0  }
  0x26   : > { %313 = sbr.rel (!%p308_p1) target bundleno = 43 (0x2b), region = 56  ;;  %315 = vst.msk [vmem:[#allocation2] sm:$0xff] (%p308_p1), %vm314_vm0, %v1631_v0  ;;  %316 = vst.msk [vmem:[#allocation2 + $0x8] sm:$0xff] (%p308_p1), %vm314_vm0, %v1631_v0 }
  0x2b PF: > { %p1308_p2 = scmp.ne.s32.totalorder %s1619_s21, 0 }
  0x2c   : > { %s321_s15 = sld [smem:[#allocation4]] (!%p1308_p2) }
  0x2d   : > { %319 = sbr.rel (%p1308_p2) target bundleno = 268 (0x10c), region = 60  ;;  %s1309_s16 = sld [smem:[#allocation4 + $0x1]] (!%p1308_p2) }
  0x2e   : > { %s1310_s17 = sld [smem:[#allocation4 + $0x2]] (!%p1308_p2) }
  0x2f   : > { %s1311_s20 = sld [smem:[#allocation4 + $0x3]] (!%p1308_p2) }
  0x30   : > { %s1312_s27 = sld [smem:[#allocation4 + $0x4]] (!%p1308_p2) }
  0x32   : > { %v341_v1 = vlaneseq  ;;  %v1314_v3 = vld [vmem:[#allocation8] ss:$0 sm:$0xff]  ;;  %v320_v5 = vld [vmem:[%s1833_s3] sm:$0x3]  ;;  %v1632_v6 = vmov 1.0   ;;  %v322_v7 = vstv %s321_s15  ;;  %v374_v25 = vld [vmem:[#allocation2 + $0x8] sm:$0xff] }
  0x33   : > { %v325_v8 = vstv %s1309_s16  ;;  %v323_v9 = vmul.f32 %v322_v7, %v320_v5  ;;  %v1313_v20 = vld [vmem:[%s1831_s1] ss:$0 sm:$0xff]  ;;  %vm452_vm6 = vcmask 130048  }
  0x34   : > { %v349_v2 = vshrl.u32 %v341_v1, 7  ;;  %v326_v10 = vmul.f32 %v325_v8, %v320_v5  ;;  %v332_v12 = vstv %s1310_s17  ;;  %v342_v16 = vand.u32 127, %v341_v1  ;;  %v373_v27 = vld [vmem:[#allocation2] sm:$0xff] }
  0x35   : > { %v336_v15 = vstv %s1311_s20 }
  0x36   : > { %v350_v4 = vadd.s32 8, %v349_v2  ;;  %vm369_vm1 = vcmp.eq.s32.totalorder %v349_v2, %v1314_v3  ;;  %v328_v11 = vrot.slane %v326_v10, 1  ;;  %v339_v18 = vstv %s1312_s27 }
  0x37   : > { %vm346_vm3 = vcmp.lt.s32.totalorder %v342_v16, 37  ;;  %v363_v21 = vsub.s32 0, %v349_v2  ;;  %vm365_vm4 = vcmp.eq.s32.totalorder %v349_v2, %v1313_v20 }
  0x38   : > { %vm370_vm2 = vcmp.eq.s32.totalorder %v350_v4, %v1314_v3  ;;  %v330_v13 = vadd.f32 %v328_v11, %v323_v9  ;;  %vm366_vm5 = vcmp.eq.s32.totalorder %v350_v4, %v1313_v20 }
  0x39   : > { %1409 = vmatprep.subr.msk.mxu0 %vm370_vm2, %v1632_v6 }
  0x3a   : > { %1410 = vmatpush3.xpose.msk.msra.mxu0 %vm370_vm2, %v1632_v6  ;;  %v333_v14 = vadd.f32 %v332_v12, %v330_v13 }
  0x3b   : > { %1411 = vmatprep.subr.msk.mxu0 %vm369_vm1, %v1632_v6 }
  0x3c   : > { %v334_v17 = vmax.f32 %v333_v14, 0.0 }
  0x3e   : > { %1412 = vmatpush3.xpose.msk.msra.mxu0 %vm369_vm1, %v1632_v6  ;;  %v337_v19 = vmul.f32 %v336_v15, %v334_v17 }
  0x40   : > { %v340_v22 = vadd.f32 %v339_v18, %v337_v19 }
  0x42   : > { %v347_v23 = vsel %vm346_vm3, %v340_v22, 0.0 }
  0x43   : > { %v364_v24 = vrot.slane %v347_v23, %v363_v21 }
  0x45   : > { %1413 = vmatprep.mubr.msk.f32.mxu0 %vm365_vm4, %v364_v24 }
  0x46   : > { %1414 = vmatmul.mubr.msk.f32.vlgmr.msra.gmra.mxu0 %vm366_vm5, %v364_v24 }
 0x106   : > { %v1415_v26 = vpop.f32.mrf.mxu0 }
 0x107   : > { %v451_v28 = vadd.f32 %v1415_v26, %v374_v25 }
 0x108   : > { %v441_v29 = vpop.f32.mrf.mxu0 }
 0x109   : > { %454 = vst.msk [vmem:[#allocation2 + $0x8] sm:$0xff] %vm452_vm6, %v451_v28  ;;  %v450_v30 = vadd.f32 %v441_v29, %v373_v27 }
 0x10b   : > { %453 = vst.msk [vmem:[#allocation2] sm:$0xff] %vm452_vm6, %v450_v30 }
 0x10c PF: > { %456 = sbr.rel (!%p308_p1) target bundleno = 1781 (0x6f5), region = 64  ;;  %v1633_v32 = vmov (%p308_p1), 0.0   ;;  %vm1634_vm7 = vmmov (%p308_p1), 0   ;;  %v457_v34 = vld [vmem:[%s1834_s4] sm:$0x1] (%p308_p1)  ;;  %vm463_vm8 = vcmask (%p308_p1), 130048  }
 0x10d   : > { %1416 = vmatprep.subr.mxu0 (%p308_p1), %v1633_v32  ;;  %1420 = vmatprep.mubr.msk.f32.mxu0 (%p308_p1), %vm1634_vm7, %v1633_v32  ;;  %s1319_s8 = sld [smem:[#allocation4 + $0x5]] (%p308_p1)  ;;  %vm541_vm9 = vcmask (%p308_p1), 122880  }
 0x10e   : > { %1423 = vmatprep.subr.mxu1 (%p308_p1), %v1633_v32  ;;  %1427 = vmatprep.mubr.msk.f32.mxu1 (%p308_p1), %vm1634_vm7, %v1633_v32  ;;  %s1321_s9 = sld [smem:[#allocation4 + $0x9]] (%p308_p1) }
 0x10f   : > { %s1322_s10 = sld [smem:[#allocation4 + $0xd]] (%p308_p1) }
 0x110   : > { %v459_v31 = vld [vmem:[#allocation2 + $0x8] sm:$0xff] (%p308_p1)  ;;  %s1323_s11 = sld [smem:[#allocation4 + $0x11]] (%p308_p1) }
 0x111   : > { %1417 = vmatpush3.msra.mxu0 %v459_v31  ;;  %1424 = vmatpush3.msra.mxu1 %v459_v31  ;;  %s1324_s12 = sld [smem:[#allocation4 + $0x6]] }
 0x112   : > { %v458_v33 = vld [vmem:[#allocation2] sm:$0xff]  ;;  %1418 = vmatprep.subr.mxu0 %v1633_v32  ;;  %1425 = vmatprep.subr.mxu1 %v1633_v32  ;;  %s1326_s13 = sld [smem:[#allocation4 + $0xa]] }
 0x113   : > { %1419 = vmatpush3.msra.mxu0 %v458_v33  ;;  %1426 = vmatpush3.msra.mxu1 %v458_v33  ;;  %v461_v35 = vstv %s1319_s8  ;;  %s1327_s14 = sld [smem:[#allocation4 + $0xe]] }
 0x114   : > { %1421 = vmatmul.mubr.msk.f32.vlgmr.msra.gmra.mxu0 %vm463_vm8, %v457_v34  ;;  %1430 = vmatprep.subr.mxu0 %v1633_v32  ;;  %v462_v36 = vmul.f32 %v461_v35, %v457_v34  ;;  %v538_v38 = vstv %s1321_s9  ;;  %s1328_s15 = sld [smem:[#allocation4 + $0x12]] }
 0x115   : > { %1431 = vmatpush3.msra.mxu0 %v459_v31  ;;  %1434 = vmatprep.mubr.msk.f32.mxu0 %vm1634_vm7, %v1633_v32  ;;  %v559_v56 = vstv %s1322_s10  ;;  %s1329_s16 = sld [smem:[#allocation4 + $0x7]] }
 0x116   : > { %1432 = vmatprep.subr.mxu0 %v1633_v32  ;;  %1437 = vmatprep.subr.mxu1 %v1633_v32  ;;  %v562_v58 = vstv %s1323_s11  ;;  %s1331_s17 = sld [smem:[#allocation4 + $0xb]] }
 0x117   : > { %1433 = vmatpush3.msra.mxu0 %v458_v33  ;;  %v565_v61 = vstv %s1324_s12  ;;  %s1332_s18 = sld [smem:[#allocation4 + $0xf]] }
 0x118   : > { %v641_v0 = vstv %s1326_s13  ;;  %s1333_s19 = sld [smem:[#allocation4 + $0x13]] }
 0x119   : > { %v661_v18 = vstv %s1327_s14  ;;  %s1334_s20 = sld [smem:[#allocation4 + $0x8]] }
 0x11a   : > { %v664_v20 = vstv %s1328_s15  ;;  %s1336_s27 = sld [smem:[#allocation4 + $0xc]] }
 0x11b   : > { %v667_v23 = vstv %s1329_s16  ;;  %s1337_s28 = sld [smem:[#allocation4 + $0x10]] }
 0x11c   : > { %v743_v26 = vstv %s1331_s17  ;;  %s1338_s29 = sld [smem:[#allocation4 + $0x14]] }
 0x11d   : > { %s1341_s30 = sld [smem:[#allocation4 + $0x17]] }
 0x11e   : > { %s1342_s7 = sld [smem:[#allocation4 + $0x18]] }
 0x11f   : > { %s1339_s8 = sld [smem:[#allocation4 + $0x15]] }
 0x120   : > { %s1340_s9 = sld [smem:[#allocation4 + $0x16]] }
 0x1d4   : > { %v533_v37 = vpop.f32.mrf.mxu0 }
 0x1d5   : > { %v534_v39 = vadd.f32 %v533_v37, %v462_v36 }
 0x1d6   : > { %v1422_v40 = vpop.f32.mrf.mxu0 }
 0x1d7   : > { %v539_v41 = vadd.f32 %v538_v38, %v534_v39 }
 0x1d9   : > { %v540_v42 = vmax.f32 %v539_v41, 0.0 }
 0x1db   : > { %v542_v43 = vsel %vm541_vm9, %v540_v42, 0.0  ;;  %v545_v44 = vmul.f32 %v540_v42, %v540_v42 }
 0x1dc   : > { %543 = vadd.xlane.f32.xlu0 %v542_v43 }
 0x1dd   : > { %v546_v45 = vsel %vm541_vm9, %v545_v44, 0.0  ;;  %v763_v44 = vstv %s1332_s18 }
 0x1e0   : > { %547 = vadd.xlane.f32.xlu0 %v546_v45 }
 0x265   : > { %v544_v46 = vpop.xlane.xlu0 %543 }
 0x266   : > { %v549_v47 = vmul.f32 0.0625, %v544_v46  ;;  %v766_v46 = vstv %s1333_s19 }
 0x268   : > { %v551_v49 = vmul.f32 %v549_v47, %v549_v47  ;;  %v554_v54 = vsub.f32 %v540_v42, %v549_v47 }
 0x269   : > { %v548_v48 = vpop.xlane.xlu0 %547 }
 0x26a   : > { %v550_v50 = vmul.f32 0.0625, %v548_v48 }
 0x26c   : > { %v552_v51 = vsub.f32 %v550_v50, %v551_v49  ;;  %v769_v49 = vstv %s1334_s20 }
 0x26e   : > { %v553_v52 = vmax.f32 %v552_v51, 0.0 }
 0x270   : > { %v555_v53 = vadd.f32 1e-05, %v553_v52  ;;  %v845_v52 = vstv %s1336_s27 }
 0x272   : > { %1522 = vrsqrt.f32 %v555_v53 }
 0x27f   : > { %v1523_v55 = vpop.eup %1522 }
 0x280   : > { %v557_v57 = vmul.f32 %v1523_v55, %v554_v54 }
 0x282   : > { %v560_v59 = vmul.f32 %v559_v56, %v557_v57 }
 0x284   : > { %v563_v60 = vadd.f32 %v562_v58, %v560_v59 }
 0x286   : > { %1428 = vmatmul.mubr.msk.f32.vlgmr.msra.gmra.mxu1 %vm463_vm8, %v563_v60  ;;  %v566_v62 = vmul.f32 %v565_v61, %v563_v60 }
 0x287   : > { %1438 = vmatpush3.msra.mxu1 %v459_v31  ;;  %1441 = vmatprep.mubr.msk.f32.mxu1 %vm1634_vm7, %v1633_v32 }
 0x288   : > { %1439 = vmatprep.subr.mxu1 %v1633_v32 }
 0x289   : > { %1440 = vmatpush3.msra.mxu1 %v458_v33 }
 0x346   : > { %v636_v63 = vpop.f32.mrf.mxu1 }
 0x347   : > { %v637_v1 = vadd.f32 %v636_v63, %v566_v62 }
 0x348   : > { %v1429_v2 = vpop.f32.mrf.mxu1 }
 0x349   : > { %v642_v3 = vadd.f32 %v641_v0, %v637_v1 }
 0x34b   : > { %v643_v4 = vmax.f32 %v642_v3, 0.0 }
 0x34d   : > { %v644_v5 = vsel %vm541_vm9, %v643_v4, 0.0  ;;  %v647_v6 = vmul.f32 %v643_v4, %v643_v4 }
 0x34e   : > { %645 = vadd.xlane.f32.xlu1 %v644_v5 }
 0x34f   : > { %v648_v7 = vsel %vm541_vm9, %v647_v6, 0.0  ;;  %v865_v6 = vstv %s1337_s28 }
 0x352   : > { %649 = vadd.xlane.f32.xlu1 %v648_v7 }
 0x3d7   : > { %v646_v8 = vpop.xlane.xlu1 %645 }
 0x3d8   : > { %v651_v9 = vmul.f32 0.0625, %v646_v8  ;;  %v868_v8 = vstv %s1338_s29 }
 0x3da   : > { %v653_v11 = vmul.f32 %v651_v9, %v651_v9  ;;  %v656_v16 = vsub.f32 %v643_v4, %v651_v9 }
 0x3db   : > { %v650_v10 = vpop.xlane.xlu1 %649 }
 0x3dc   : > { %v652_v12 = vmul.f32 0.0625, %v650_v10  ;;  %v877_v10 = vstv %s1341_s30 }
 0x3de   : > { %v654_v13 = vsub.f32 %v652_v12, %v653_v11  ;;  %v880_v12 = vstv %s1342_s7 }
 0x3e0   : > { %v655_v14 = vmax.f32 %v654_v13, 0.0 }
 0x3e2   : > { %v657_v15 = vadd.f32 1e-05, %v655_v14 }
 0x3e4   : > { %1524 = vrsqrt.f32 %v657_v15 }
 0x3f1   : > { %v1525_v17 = vpop.eup %1524 }
 0x3f2   : > { %v659_v19 = vmul.f32 %v1525_v17, %v656_v16 }
 0x3f4   : > { %v662_v21 = vmul.f32 %v661_v18, %v659_v19  ;;  %v871_v18 = vstv %s1339_s8 }
 0x3f6   : > { %v665_v22 = vadd.f32 %v664_v20, %v662_v21  ;;  %v874_v20 = vstv %s1340_s9  ;;  %v883_v21 = vld [vmem:[%s1835_s5] sm:$0x1] }
 0x3f8   : > { %1435 = vmatmul.mubr.msk.f32.vlgmr.msra.gmra.mxu0 %vm463_vm8, %v665_v22  ;;  %v668_v24 = vmul.f32 %v667_v23, %v665_v22 }
 0x4b8   : > { %v738_v25 = vpop.f32.mrf.mxu0 }
 0x4b9   : > { %v739_v27 = vadd.f32 %v738_v25, %v668_v24 }
 0x4ba   : > { %v1436_v28 = vpop.f32.mrf.mxu0 }
 0x4bb   : > { %v744_v29 = vadd.f32 %v743_v26, %v739_v27 }
 0x4bd   : > { %v745_v30 = vmax.f32 %v744_v29, 0.0 }
 0x4bf   : > { %v746_v31 = vsel %vm541_vm9, %v745_v30, 0.0  ;;  %v749_v32 = vmul.f32 %v745_v30, %v745_v30 }
 0x4c0   : > { %747 = vadd.xlane.f32.xlu0 %v746_v31 }
 0x4c1   : > { %v750_v33 = vsel %vm541_vm9, %v749_v32, 0.0 }
 0x4c2   : > { %751 = vadd.xlane.f32.xlu1 %v750_v33 }
 0x549   : > { %v748_v34 = vpop.xlane.xlu0 %747 }
 0x54a   : > { %v753_v35 = vmul.f32 0.0625, %v748_v34 }
 0x54b   : > { %v752_v36 = vpop.xlane.xlu1 %751 }
 0x54c   : > { %v755_v37 = vmul.f32 %v753_v35, %v753_v35  ;;  %v754_v38 = vmul.f32 0.0625, %v752_v36  ;;  %v758_v42 = vsub.f32 %v745_v30, %v753_v35 }
 0x54e   : > { %v756_v39 = vsub.f32 %v754_v38, %v755_v37 }
 0x550   : > { %v757_v40 = vmax.f32 %v756_v39, 0.0 }
 0x552   : > { %v759_v41 = vadd.f32 1e-05, %v757_v40 }
 0x554   : > { %1526 = vrsqrt.f32 %v759_v41 }
 0x561   : > { %v1527_v43 = vpop.eup %1526 }
 0x562   : > { %v761_v45 = vmul.f32 %v1527_v43, %v758_v42 }
 0x564   : > { %v764_v47 = vmul.f32 %v763_v44, %v761_v45 }
 0x566   : > { %v767_v48 = vadd.f32 %v766_v46, %v764_v47 }
 0x568   : > { %1442 = vmatmul.mubr.msk.f32.vlgmr.msra.gmra.mxu1 %vm463_vm8, %v767_v48  ;;  %v770_v50 = vmul.f32 %v769_v49, %v767_v48 }
 0x628   : > { %v840_v51 = vpop.f32.mrf.mxu1 }
 0x629   : > { %v841_v53 = vadd.f32 %v840_v51, %v770_v50 }
 0x62a   : > { %v1443_v54 = vpop.f32.mrf.mxu1 }
 0x62b   : > { %v846_v55 = vadd.f32 %v845_v52, %v841_v53 }
 0x62d   : > { %v847_v56 = vmax.f32 %v846_v55, 0.0 }
 0x62f   : > { %v848_v57 = vsel %vm541_vm9, %v847_v56, 0.0  ;;  %v851_v58 = vmul.f32 %v847_v56, %v847_v56 }
 0x630   : > { %849 = vadd.xlane.f32.xlu0 %v848_v57 }
 0x631   : > { %v852_v59 = vsel %vm541_vm9, %v851_v58, 0.0 }
 0x632   : > { %853 = vadd.xlane.f32.xlu1 %v852_v59 }
 0x6b9   : > { %v850_v60 = vpop.xlane.xlu0 %849 }
 0x6ba   : > { %v855_v61 = vmul.f32 0.0625, %v850_v60 }
 0x6bb   : > { %v854_v62 = vpop.xlane.xlu1 %853 }
 0x6bc   : > { %v857_v63 = vmul.f32 %v855_v61, %v855_v61  ;;  %v856_v0 = vmul.f32 0.0625, %v854_v62  ;;  %v860_v4 = vsub.f32 %v847_v56, %v855_v61 }
 0x6be   : > { %v858_v1 = vsub.f32 %v856_v0, %v857_v63 }
 0x6c0   : > { %v859_v2 = vmax.f32 %v858_v1, 0.0 }
 0x6c2   : > { %v861_v3 = vadd.f32 1e-05, %v859_v2 }
 0x6c4   : > { %1528 = vrsqrt.f32 %v861_v3 }
 0x6d1   : > { %v1529_v5 = vpop.eup %1528 }
 0x6d2   : > { %v863_v7 = vmul.f32 %v1529_v5, %v860_v4 }
 0x6d4   : > { %v866_v9 = vmul.f32 %v865_v6, %v863_v7 }
 0x6d6   : > { %v869_v11 = vadd.f32 %v868_v8, %v866_v9 }
 0x6d8   : > { %v878_v13 = vmul.f32 %v877_v10, %v869_v11  ;;  %v872_v19 = vmul.f32 %v871_v18, %v869_v11 }
 0x6da   : > { %v881_v14 = vadd.f32 %v880_v12, %v878_v13  ;;  %v875_v23 = vadd.f32 %v874_v20, %v872_v19 }
 0x6dc   : > { %v882_v15 = vmin.f32 %v881_v14, 10.0 }
 0x6de   : > { %v884_v16 = vmul.f32 0.5, %v882_v15 }
 0x6e0   : > { %v885_v17 = vmul.f32 1.442695, %v884_v16 }
 0x6e2   : > { %1530 = vpow2.f32 %v885_v17 }
 0x6ef   : > { %v1531_v22 = vpop.eup %1530 }
 0x6f0   : > { %v887_v24 = vmul.f32 %v1531_v22, %v883_v21 }
 0x6f2   : > { %v888_v25 = vadd.f32 %v887_v24, %v875_v23 }
 0x6f4   : > { %889 = vst.msk [vmem:[#allocation3] sm:$0x1] %vm541_vm9, %v888_v25 }
 0x6f5 PF: > { %p1343_p3 = scmp.ne.s32.totalorder %s1619_s21, 1 }
 0x6f6   : > { %s1352_s21 = sld [smem:[#allocation4 + $0x19]] (!%p1343_p3) }
 0x6f7   : > { %893 = sbr.rel (%p1343_p3) target bundleno = 2033 (0x7f1), region = 68  ;;  %s1355_s14 = sld [smem:[#allocation4 + $0x1a]] (!%p1343_p3) }
 0x6f8   : > { %s1353_s15 = sld [smem:[#allocation4 + $0x1b]] (!%p1343_p3) }
 0x6f9   : > { %s1356_s16 = sld [smem:[#allocation4 + $0x1c]] (!%p1343_p3) }
 0x6fa   : > { %s1354_s17 = sld [smem:[#allocation4 + $0x2d]] (!%p1343_p3) }
 0x6fb   : > { %s1357_s18 = sld [smem:[#allocation4 + $0x2e]] (!%p1343_p3) }
 0x6fc   : > { %v895_v26 = vlaneseq  ;;  %v1635_v27 = vmov 0.0   ;;  %vm1636_vm10 = vmmov 0   ;;  %v1344_v29 = vld [vmem:[%s1831_s1] ss:$0 sm:$0xff]  ;;  %v1348_v30 = vld [vmem:[#allocation8] ss:$0 sm:$0xff]  ;;  %v1061_v34 = vstv %s1352_s21 }
 0x6fd   : > { %1444 = vmatprep.subr.mxu0 %v1635_v27  ;;  %1451 = vmatprep.subr.mxu1 %v1635_v27  ;;  %v1637_v32 = vmov 1.0   ;;  %v894_v33 = vld [vmem:[#allocation3] sm:$0x1]  ;;  %vm907_vm15 = vcmask 130048   ;;  %s1775_s19 = sld [smem:[#allocation4 + $0x1d]]  ;;  %v1071_v35 = vstv %s1355_s14  ;;  %vm1171_vm0 = vcmask 1040384  }
 0x6fe   : > { %v896_v28 = vshrl.u32 %v895_v26, 7  ;;  %1448 = vmatprep.mubr.msk.f32.mxu0 %vm1636_vm10, %v1635_v27  ;;  %1455 = vmatprep.mubr.msk.f32.mxu1 %vm1636_vm10, %v1635_v27  ;;  %s1777_s20 = sld [smem:[#allocation4 + $0x1f]]  ;;  %v1064_v36 = vstv %s1353_s15 }
 0x6ff   : > { %s1779_s27 = sld [smem:[#allocation4 + $0x1e]]  ;;  %v1074_v37 = vstv %s1356_s16 }
 0x700   : > { %v897_v31 = vadd.s32 8, %v896_v28  ;;  %vm903_vm13 = vcmp.eq.s32.totalorder %v896_v28, %v1344_v29  ;;  %vm986_vm14 = vcmp.eq.s32.totalorder %v896_v28, %v1348_v30  ;;  %s1362_s28 = sld [smem:[#allocation4 + $0x20]]  ;;  %v1068_v44 = vstv %s1354_s17 }
 0x701   : > { %s1781_s29 = sld [smem:[#allocation4 + $0x2f]]  ;;  %v1078_v45 = vstv %s1357_s18 }
 0x702   : > { %vm904_vm11 = vcmp.eq.s32.totalorder %v897_v31, %v1344_v29  ;;  %vm987_vm12 = vcmp.eq.s32.totalorder %v897_v31, %v1348_v30  ;;  %s1363_s30 = sld [smem:[#allocation4 + $0x30]] }
 0x703   : > { %1445 = vmatpush3.msk.msra.mxu0 %vm904_vm11, %v1637_v32  ;;  %1452 = vmatpush3.msk.msra.mxu1 %vm987_vm12, %v1637_v32  ;;  %s1783_s7 = sld [smem:[#allocation4 + $0x21]]  ;;  %v1083_v52 = vstv %s1775_s19 }
 0x704   : > { %1446 = vmatprep.subr.mxu0 %v1635_v27  ;;  %1453 = vmatprep.subr.mxu1 %v1635_v27  ;;  %s1785_s8 = sld [smem:[#allocation4 + $0x23]]  ;;  %v1086_v53 = vstv %s1777_s20 }
 0x705   : > { %1447 = vmatpush3.msk.msra.mxu0 %vm903_vm13, %v1637_v32  ;;  %1454 = vmatpush3.msk.msra.mxu1 %vm986_vm14, %v1637_v32  ;;  %s1787_s9 = sld [smem:[#allocation4 + $0x22]]  ;;  %v1093_v54 = vstv %s1779_s27 }
 0x706   : > { %1449 = vmatmul.mubr.msk.f32.vlgmr.msra.gmra.mxu0 %vm907_vm15, %v894_v33  ;;  %1456 = vmatmul.mubr.msk.f32.vlgmr.msra.gmra.mxu1 %vm907_vm15, %v894_v33  ;;  %v1096_v55 = vstv %s1362_s28  ;;  %s1368_s10 = sld [smem:[#allocation4 + $0x24]] }
 0x707   : > { %s1366_s11 = sld [smem:[#allocation4 + $0x31]]  ;;  %v1090_v62 = vstv %s1781_s29 }
 0x708   : > { %v1100_v63 = vstv %s1363_s30  ;;  %s1369_s12 = sld [smem:[#allocation4 + $0x32]] }
 0x709   : > { %s1793_s13 = sld [smem:[#allocation4 + $0x25]]  ;;  %v1105_v4 = vstv %s1783_s7 }
 0x70a   : > { %s1795_s21 = sld [smem:[#allocation4 + $0x27]]  ;;  %v1108_v5 = vstv %s1785_s8 }
 0x70b   : > { %s1797_s14 = sld [smem:[#allocation4 + $0x26]]  ;;  %v1115_v6 = vstv %s1787_s9 }
 0x70c   : > { %v1118_v7 = vstv %s1368_s10  ;;  %s1374_s15 = sld [smem:[#allocation4 + $0x28]] }
 0x70d   : > { %s1372_s16 = sld [smem:[#allocation4 + $0x33]]  ;;  %v1112_v14 = vstv %s1366_s11 }
 0x70e   : > { %v1122_v15 = vstv %s1369_s12  ;;  %s1375_s17 = sld [smem:[#allocation4 + $0x34]] }
 0x70f   : > { %s1376_s18 = sld [smem:[#allocation4 + $0x29]]  ;;  %v1127_v20 = vstv %s1793_s13 }
 0x710   : > { %s1377_s19 = sld [smem:[#allocation4 + $0x2b]]  ;;  %v1130_v21 = vstv %s1795_s21 }
 0x711   : > { %s1379_s20 = sld [smem:[#allocation4 + $0x2a]]  ;;  %v1137_v22 = vstv %s1797_s14 }
 0x712   : > { %v1140_v23 = vstv %s1374_s15  ;;  %s1380_s27 = sld [smem:[#allocation4 + $0x2c]] }
 0x713   : > { %v1134_v30 = vstv %s1372_s16  ;;  %s1381_s28 = sld [smem:[#allocation4 + $0x36]] }
 0x714   : > { %v1144_v31 = vstv %s1375_s17  ;;  %s1378_s29 = sld [smem:[#allocation4 + $0x35]] }
 0x7c6   : > { %v977_v38 = vpop.f32.mrf.mxu0  ;;  %v1056_v39 = vpop.f32.mrf.mxu1 }
 0x7c7   : > { %v1062_v40 = vmul.f32 %v1061_v34, %v977_v38  ;;  %v1072_v41 = vmul.f32 %v1071_v35, %v977_v38  ;;  %v1065_v42 = vmul.f32 %v1064_v36, %v1056_v39  ;;  %v1075_v43 = vmul.f32 %v1074_v37, %v1056_v39 }
 0x7c8   : > { %v1450_v46 = vpop.f32.mrf.mxu0  ;;  %v1457_v47 = vpop.f32.mrf.mxu1  ;;  %v1149_v36 = vstv %s1376_s18  ;;  %v1152_v37 = vstv %s1377_s19  ;;  %v1159_v38 = vstv %s1379_s20  ;;  %v1162_v39 = vstv %s1380_s27 }
 0x7c9   : > { %v1066_v48 = vadd.f32 %v1065_v42, %v1062_v40  ;;  %v1076_v49 = vadd.f32 %v1075_v43, %v1072_v41  ;;  %v1166_v46 = vstv %s1381_s28 }
 0x7cb   : > { %v1069_v50 = vadd.f32 %v1068_v44, %v1066_v48  ;;  %v1079_v51 = vadd.f32 %v1078_v45, %v1076_v49  ;;  %v1156_v49 = vstv %s1378_s29 }
 0x7cd   : > { %v1080_v56 = vmax.f32 %v1069_v50, 0.0  ;;  %v1081_v57 = vmax.f32 %v1079_v51, 0.0 }
 0x7cf   : > { %v1084_v58 = vmul.f32 %v1083_v52, %v1080_v56  ;;  %v1087_v59 = vmul.f32 %v1086_v53, %v1081_v57  ;;  %v1094_v60 = vmul.f32 %v1093_v54, %v1080_v56  ;;  %v1097_v61 = vmul.f32 %v1096_v55, %v1081_v57 }
 0x7d1   : > { %v1088_v0 = vadd.f32 %v1087_v59, %v1084_v58  ;;  %v1098_v1 = vadd.f32 %v1097_v61, %v1094_v60 }
 0x7d3   : > { %v1091_v2 = vadd.f32 %v1090_v62, %v1088_v0  ;;  %v1101_v3 = vadd.f32 %v1100_v63, %v1098_v1 }
 0x7d5   : > { %v1102_v8 = vmax.f32 %v1091_v2, 0.0  ;;  %v1103_v9 = vmax.f32 %v1101_v3, 0.0 }
 0x7d7   : > { %v1106_v10 = vmul.f32 %v1105_v4, %v1102_v8  ;;  %v1109_v11 = vmul.f32 %v1108_v5, %v1103_v9  ;;  %v1116_v12 = vmul.f32 %v1115_v6, %v1102_v8  ;;  %v1119_v13 = vmul.f32 %v1118_v7, %v1103_v9 }
 0x7d9   : > { %v1110_v16 = vadd.f32 %v1109_v11, %v1106_v10  ;;  %v1120_v17 = vadd.f32 %v1119_v13, %v1116_v12 }
 0x7db   : > { %v1113_v18 = vadd.f32 %v1112_v14, %v1110_v16  ;;  %v1123_v19 = vadd.f32 %v1122_v15, %v1120_v17 }
 0x7dd   : > { %v1124_v24 = vmax.f32 %v1113_v18, 0.0  ;;  %v1125_v25 = vmax.f32 %v1123_v19, 0.0 }
 0x7df   : > { %v1128_v26 = vmul.f32 %v1127_v20, %v1124_v24  ;;  %v1131_v27 = vmul.f32 %v1130_v21, %v1125_v25  ;;  %v1138_v28 = vmul.f32 %v1137_v22, %v1124_v24  ;;  %v1141_v29 = vmul.f32 %v1140_v23, %v1125_v25 }
 0x7e1   : > { %v1132_v32 = vadd.f32 %v1131_v27, %v1128_v26  ;;  %v1142_v33 = vadd.f32 %v1141_v29, %v1138_v28 }
 0x7e3   : > { %v1135_v34 = vadd.f32 %v1134_v30, %v1132_v32  ;;  %v1145_v35 = vadd.f32 %v1144_v31, %v1142_v33 }
 0x7e5   : > { %v1146_v40 = vmax.f32 %v1135_v34, 0.0  ;;  %v1147_v41 = vmax.f32 %v1145_v35, 0.0 }
 0x7e7   : > { %v1150_v42 = vmul.f32 %v1149_v36, %v1146_v40  ;;  %v1153_v43 = vmul.f32 %v1152_v37, %v1147_v41  ;;  %v1160_v44 = vmul.f32 %v1159_v38, %v1146_v40  ;;  %v1163_v45 = vmul.f32 %v1162_v39, %v1147_v41 }
 0x7e9   : > { %v1154_v47 = vadd.f32 %v1153_v43, %v1150_v42  ;;  %v1164_v48 = vadd.f32 %v1163_v45, %v1160_v44 }
 0x7eb   : > { %v1167_v50 = vadd.f32 %v1166_v46, %v1164_v48  ;;  %v1157_v51 = vadd.f32 %v1156_v49, %v1154_v47 }
 0x7ed   : > { %v1169_v52 = vrot.slane %v1167_v50, 7 }
 0x7ef   : > { %v1172_v53 = vsel %vm1171_vm0, %v1157_v51, %v1169_v52 }
 0x7f0   : > { %1173 = vst [vmem:[#allocation9] sm:$0x3] %v1172_v53 }
 0x7f1 PF: > { %p1807_p4 = scmp.eq.s32.totalorder %s1297_s24, 1  ;;  %s1638_s7 = smov [#allocation9]  }
 0x7f2   : > { %s1189_s8 = sshll.u32 %s1638_s7, 4  ;;  %s1190_s8 = int_to_ptr.vmem [resolvable:$true] %s1189_s8 }
 0x7f3   : > { %s1569_s9 = scalar_lea.vmem %s1190_s8, 32  ;;  %s1575_s10 = scalar_lea.vmem %s1190_s8, 64 }
 0x7f4   : > { %p1570_p5 = scmp.ne.s32.totalorder %s1190_s8, %s1569_s9  ;;  %p1576_p8 = scmp.lt.s32.totalorder %s1190_s8, %s1190_s8 }
 0x7f5   : > { %p1577_p9 = scmp.lt.s32.totalorder %s1575_s10, %s1569_s9 }
 0x7f6   : > { %p1571_p6 = pnand %p1570_p5, %p1807_p4 }
 0x7f7   : > { %p1578_p10 = por %p1577_p9, %p1576_p8 }
 0x7f8   : > { %p1572_p7 = pneg %p1571_p6 }
 0x7fa   : > { %p1579_p11 = pnand %p1578_p10, %p1572_p7 }
 0x7fc   : > { %1582 = shalt.err (!%p1579_p11)
}
 0x7fd   : > { %1467 = dma.vmem_to_hbm [thread:$0]  (%p1807_p4), %s1190_s8, 32, %s1836_s6, [#allocation6]  }
 0x7fe PF: > { %p1486_p12 = scmp.ge.s32.totalorder %s1627_s23, 2  ;;  %p1487_p13 = scmp.eq.s32.totalorder %s1298_s25, 1 }
 0x800   : > { %p1478_p0 = pnand %p1487_p13, %p1486_p12 }
 0x802   : > { %p1479_p1 = pneg %p1478_p0 }
 0x804   : > { %1614 = dma.done.wait (%p1479_p1), [#allocation6], 32  }
 0x805   : > { %1616 = vsyncadd (%p1479_p1), [#allocation6], 4294967264  ;;  %s21_s23 = sadd.s32 1, %s1627_s23   ;;  %s1841_s21 = smov %s1623_s22 }
 0x806   : > { %p18_p2 = scmp.ge.s32.totalorder %s21_s23, 4   ;;  %s1842_s22 = smov %s1844_s26 }
 0x808   :  { %20 = sbr.rel (!%p18_p2) target bundleno = 5 (0x5), region = 109 }
 0x80d   :  { %1207 = vsyncpa [#allocation5], 1 }
 0x80e   :  { %1209 = vsyncpa [#allocation5 + $0x1], 1 }
 0x80f   :  { %1210 = vsyncpa [#allocation6], 1 }
 0x810   :  { %1212 = vsyncpa [#allocation6 + $0x1], 1 }
 0x811   :  { %1213 = vsyncpa [#allocation7], 1 }
 0x812   :  { %1215 = vsyncpa [#allocation7 + $0x1], 1 }

</bundles_post_ra>
